<compile_context>
chip_gen: v6e
topology: v6e:2x2x1
jax: 0.10.0
libtpu: 0.0.40
codegen_flags: <defaults>
</compile_context>

<pallas_src>
import jax
import jax.numpy as jnp
from jax.experimental import pallas as pl
from jax.experimental.pallas import tpu as pltpu

NEG_SLOPE = 0.2
MASK_VALUE = -1e30


# ----------------------------- Pallas kernel --------------------------------

def _fused_gatv2_kernel(x_ref, mask_ref, eflat_ref, wlr_ref, we_ref, vec_ref,
                        lin_ref, out_ref):
    NPG = x_ref.shape[1]          # nodes in this per-graph block
    C = we_ref.shape[2]           # hidden channels (heads=1)
    LP1 = wlr_ref.shape[0]        # conv1 + hidden layers

    # Graph-block data, loaded once and reused by every layer.
    mask_add = mask_ref[0].astype(jnp.float32)       # [NPG, NPG] additive mask
    eflat_bf = eflat_ref[0]                          # [NPG*NPG, Fe] bf16

    def gat_layer(h_bf, l):
        # Fused left/right projection: one MXU push instead of two.
        glgr = jnp.dot(h_bf, wlr_ref[l],
                       preferred_element_type=jnp.float32)          # [NPG, 2C]
        vecs = vec_ref[l]                             # [4, C]: bl | br | att | bias
        gl = glgr[:, :C] + vecs[0:1, :]
        gr = glgr[:, C:] + vecs[1:2, :]
        att = vecs[2:3, :]
        bias = vecs[3:4, :]

        ge = jnp.dot(eflat_bf, we_ref[l],
                     preferred_element_type=jnp.float32).reshape(NPG, NPG, C)

        # GATv2 logits: att . leaky_relu(x_i + x_j + e_ij).
        z = gr[:, None, :] + gl[None, :, :] + ge                    # [NPG,NPG,C]
        z = jnp.maximum(z, NEG_SLOPE * z)             # leaky_relu as one vmax
        scores = jnp.sum(z * att[None, :, :], axis=-1) + mask_add   # [NPG, NPG]

        # Softmax over sources j; every row has a self loop, so sum >= 1 and
        # masked entries underflow to exactly 0 after exp.
        m = jnp.max(scores, axis=-1, keepdims=True)
        p = jnp.exp(scores - m)
        alpha = p * pl.reciprocal(jnp.sum(p, axis=-1, keepdims=True), approx=True)

        # alpha/gl are vreg-resident: keep the aggregation in f32 (no packs).
        agg = jnp.dot(alpha, gl, preferred_element_type=jnp.float32) + bias
        return jnp.maximum(agg, 0.0).astype(jnp.bfloat16)   # ReLU + single cast

    h = x_ref[0]                                      # [NPG, C] bf16 (pre-padded)
    for l in range(LP1):                              # static unroll over layers
        h = gat_layer(h, l)

    # global_mean_pool: one graph per grid step -> plain row mean.
    pooled = jnp.mean(h.astype(jnp.float32), axis=0, keepdims=True)   # [1, C]
    lin = lin_ref[...]                                # [C+1, 128]: W | b
    logits = (jnp.dot(pooled, lin[:C, :], preferred_element_type=jnp.float32)
              + lin[C:C + 1, :])                      # [1, 128]
    # TODO(synk): F.dropout(training=True) (random mask) not implemented;
    # eval-mode dropout is identity, which is what is applied here.
    # Lane-dense unmasked store: broadcast into the full (8,128) tile.
    out_ref[...] = jnp.broadcast_to(logits[None, :, :], out_ref.shape)


# ------------------------------ JAX wrapper ----------------------------------

def _gatv2_forward(x_blk, mask_blk, eflat_blk, wlr, we, vec, lin):
    """Fused GATv2.forward: one pallas_call, grid over graphs."""
    B, NPG, CP = x_blk.shape
    LP1, C, C2 = wlr.shape
    Fe = we.shape[1]
    OUT_ROWS = 8
    OUT_LANES = lin.shape[1]

    return pl.pallas_call(
        _fused_gatv2_kernel,
        out_shape=jax.ShapeDtypeStruct((B, OUT_ROWS, OUT_LANES), jnp.float32),
        grid=(B,),
        in_specs=[
            pl.BlockSpec((1, NPG, CP), lambda b: (b, 0, 0)),          # x (bf16)
            pl.BlockSpec((1, NPG, NPG), lambda b: (b, 0, 0)),         # mask (bf16)
            pl.BlockSpec((1, NPG * NPG, Fe), lambda b: (b, 0, 0)),    # edges (bf16)
            pl.BlockSpec((LP1, C, C2), lambda b: (0, 0, 0)),          # W_lr stack
            pl.BlockSpec((LP1, Fe, C), lambda b: (0, 0, 0)),          # W_e stack
            pl.BlockSpec((LP1, 4, C), lambda b: (0, 0, 0)),           # bl|br|att|bias
            pl.BlockSpec((C + 1, OUT_LANES), lambda b: (0, 0)),       # lin W|b
        ],
        out_specs=pl.BlockSpec((1, OUT_ROWS, OUT_LANES), lambda b: (b, 0, 0)),
        compiler_params=pltpu.CompilerParams(
            dimension_semantics=("parallel",),        # megacore on v7x
            vmem_limit_bytes=32 * 1024 * 1024,
        ),
    )(x_blk, mask_blk, eflat_blk, wlr, we, vec, lin)


gatv2_forward = jax.jit(_gatv2_forward)


# --------------------- one-time host-side packing ----------------------------

def pack_params(params, c_hidden, n_classes, out_lanes=128):
    """Stack conv1 with the hidden layers, fuse Wl|Wr, pre-cast weights bf16."""
    layers = [params["conv1"]] + list(params["hidden"])

    def pad_rows(w):
        # conv1's input dim may be < C; zero-pad rows so all layers share [C,.].
        if w.shape[0] == c_hidden:
            return w
        return jnp.zeros((c_hidden, w.shape[1]), w.dtype).at[:w.shape[0]].set(w)

    wlr = jnp.stack([jnp.concatenate([pad_rows(p["wl"]), pad_rows(p["wr"])], axis=1)
                     for p in layers]).astype(jnp.bfloat16)            # [L+1, C, 2C]
    we = jnp.stack([p["we"] for p in layers]).astype(jnp.bfloat16)     # [L+1, Fe, C]
    vec = jnp.stack([jnp.concatenate([p["bl"], p["br"], p["att"], p["bias"]], axis=0)
                     for p in layers]).astype(jnp.float32)             # [L+1, 4, C]
    lin = jnp.zeros((c_hidden + 1, out_lanes), jnp.float32)
    lin = lin.at[:c_hidden, :n_classes].set(params["lin_w"])
    lin = lin.at[c_hidden, :n_classes].set(params["lin_b"][0])
    return {"wlr": wlr, "we": we, "vec": vec, "lin": lin}


def pack_graph(x, adj, edge_dense, num_graphs, c_hidden):
    """Per-graph block layout (batched adjacency is block-diagonal).

    Assumes (as in this demo) equal-size graphs laid out contiguously; unequal
    graphs would be handled by per-graph padding to a common block size.
    """
    n, f_in = x.shape
    npg = n // num_graphs
    fe = edge_dense.shape[-1]
    assert f_in <= c_hidden, "node features are zero-padded up to hidden width"
    x_pad = jnp.zeros((n, c_hidden), jnp.float32).at[:, :f_in].set(x)
    x_blk = x_pad.reshape(num_graphs, npg, c_hidden).astype(jnp.bfloat16)
    idx = jnp.arange(num_graphs)
    adj_blk = adj.reshape(num_graphs, npg, num_graphs, npg)[idx, :, idx, :]
    mask_blk = jnp.where(adj_blk > 0, 0.0, MASK_VALUE).astype(jnp.bfloat16)
    ed_blk = edge_dense.reshape(num_graphs, npg, num_graphs, npg, fe)[idx, :, idx, :, :]
    eflat_blk = ed_blk.reshape(num_graphs, npg * npg, fe).astype(jnp.bfloat16)
    return {"x": x_blk, "mask": mask_blk, "eflat": eflat_blk}


# --------------------------- pure-JAX reference ------------------------------

def _ref_layer(x, adj, edge_dense, p):
    hp = jax.lax.Precision.HIGHEST
    gl = jnp.dot(x, p["wl"], precision=hp) + p["bl"]
    gr = jnp.dot(x, p["wr"], precision=hp) + p["br"]
    ge = jnp.einsum("ijf,fc->ijc", edge_dense, p["we"], precision=hp)
    z = gr[:, None, :] + gl[None, :, :] + ge
    z = jnp.where(z > 0, z, NEG_SLOPE * z)
    scores = jnp.sum(z * p["att"][None, :, :], axis=-1)
    scores = jnp.where(adj > 0, scores, -jnp.inf)
    alpha = jax.nn.softmax(scores, axis=-1)
    out = jnp.dot(alpha, gl, precision=hp) + p["bias"]
    return jax.nn.relu(out)


def _ref_forward(x, adj, edge_dense, pool_mat, params):
    hp = jax.lax.Precision.HIGHEST
    h = _ref_layer(x, adj, edge_dense, params["conv1"])
    for p in params["hidden"]:
        h = _ref_layer(h, adj, edge_dense, p)
    pooled = jnp.dot(pool_mat, h, precision=hp)
    return jnp.dot(pooled, params["lin_w"], precision=hp) + params["lin_b"]


# ------------------------------ param init -----------------------------------

def _glorot(key, fan_in, fan_out):
    lim = (6.0 / (fan_in + fan_out)) ** 0.5
    return jax.random.uniform(key, (fan_in, fan_out), jnp.float32, -lim, lim)


def make_conv_params(key, f_in, f_out, f_edge):
    ks = jax.random.split(key, 4)
    return {
        "wl": _glorot(ks[0], f_in, f_out),
        "bl": jnp.zeros((1, f_out), jnp.float32),
        "wr": _glorot(ks[1], f_in, f_out),
        "br": jnp.zeros((1, f_out), jnp.float32),
        "we": _glorot(ks[2], f_edge, f_out),          # lin_edge (no bias in PyG)
        "att": _glorot(ks[3], 1, f_out),              # att param (1, heads*C)
        "bias": jnp.zeros((1, f_out), jnp.float32),
    }


# --------------------------------- main --------------------------------------

if __name__ == "__main__":
    key = jax.random.PRNGKey(0)

    # Dataset-like sizes (small, synthetic).
    NUM_NODE_FEATURES = 8
    NUM_EDGE_FEATURES = 4
    OUT_CHANNELS = 32
    NUM_CLASSES = 3
    N_HIDDEN_LAYERS = 2
    NODES_PER_GRAPH = 8
    NUM_GRAPHS = 2
    N = NODES_PER_GRAPH * NUM_GRAPHS

    # Node features, batch assignment.
    k_x, k_e, k_p1, k_ph, k_pl = jax.random.split(key, 5)
    x = jax.random.normal(k_x, (N, NUM_NODE_FEATURES), jnp.float32)
    batch = jnp.repeat(jnp.arange(NUM_GRAPHS), NODES_PER_GRAPH)

    # Deterministic directed edges within each graph (no self loops, no dups).
    src_list, dst_list = [], []
    for g in range(NUM_GRAPHS):
        off = g * NODES_PER_GRAPH
        for n in range(NODES_PER_GRAPH):
            for hop in (1, 3):
                src_list.append(off + n)
                dst_list.append(off + (n + hop) % NODES_PER_GRAPH)
    src = jnp.array(src_list, jnp.int32)
    dst = jnp.array(dst_list, jnp.int32)
    E = src.shape[0]
    edge_attr = jax.random.normal(k_e, (E, NUM_EDGE_FEATURES), jnp.float32)

    # Densify: adj[target, source], edge_dense[target, source, :].
    adj = jnp.zeros((N, N), jnp.float32).at[dst, src].set(1.0)
    edge_dense = jnp.zeros((N, N, NUM_EDGE_FEATURES), jnp.float32).at[dst, src].set(edge_attr)
    # add_self_loops(fill_value='mean'): self-loop attr = mean of incoming attrs.
    in_sum = jnp.zeros((N, NUM_EDGE_FEATURES), jnp.float32).at[dst].add(edge_attr)
    in_cnt = jnp.zeros((N,), jnp.float32).at[dst].add(1.0)
    loop_attr = in_sum / jnp.maximum(in_cnt, 1.0)[:, None]
    diag = jnp.arange(N)
    adj = adj.at[diag, diag].set(1.0)
    edge_dense = edge_dense.at[diag, diag].set(loop_attr)

    # Parameters (deterministic).
    params = {
        "conv1": make_conv_params(k_p1, NUM_NODE_FEATURES, OUT_CHANNELS, NUM_EDGE_FEATURES),
        "hidden": [
            make_conv_params(k, OUT_CHANNELS, OUT_CHANNELS, NUM_EDGE_FEATURES)
            for k in jax.random.split(k_ph, N_HIDDEN_LAYERS)
        ],
        "lin_w": _glorot(k_pl, OUT_CHANNELS, NUM_CLASSES),
        "lin_b": jnp.zeros((1, NUM_CLASSES), jnp.float32),
    }

    # One-time host-side packing (hoisted out of the forward call path).
    packed = pack_params(params, OUT_CHANNELS, NUM_CLASSES)
    graph = pack_graph(x, adj, edge_dense, NUM_GRAPHS, OUT_CHANNELS)

    out_pad = gatv2_forward(graph["x"], graph["mask"], graph["eflat"],
                            packed["wlr"], packed["we"], packed["vec"], packed["lin"])
    out_pad = jax.block_until_ready(out_pad)
    out = out_pad[:, 0, :NUM_CLASSES]                 # [num_graphs, num_classes]

    # Full-graph f32 reference (global_mean_pool expressed as a pooling matrix).
    one_hot = (batch[None, :] == jnp.arange(NUM_GRAPHS)[:, None]).astype(jnp.float32)
    pool_mat = one_hot / jnp.sum(one_hot, axis=1, keepdims=True)
    ref = _ref_forward(x, adj, edge_dense, pool_mat, params)

    assert out.shape == (NUM_GRAPHS, NUM_CLASSES)
    # bf16 MXU operands / bf16 activations + approx reciprocal vs f32 reference.
    assert jnp.allclose(out, ref, atol=5e-2, rtol=5e-2), (out, ref)

    print("KERNEL_OK")
</pallas_src>

<mosaic_0001>
module attributes {stable_mosaic.version = 11 : i64} {
  func.func @_fused_gatv2_kernel(%arg0: i32, %arg1: memref<1x8x32xbf16, #tpu.memory_space<vmem>>, %arg2: memref<1x8x8xbf16, #tpu.memory_space<vmem>>, %arg3: memref<1x64x4xbf16, #tpu.memory_space<vmem>>, %arg4: memref<3x32x64xbf16, #tpu.memory_space<vmem>>, %arg5: memref<3x4x32xbf16, #tpu.memory_space<vmem>>, %arg6: memref<3x4x32xf32, #tpu.memory_space<vmem>>, %arg7: memref<33x128xf32, #tpu.memory_space<vmem>>, %arg8: memref<1x8x128xf32, #tpu.memory_space<vmem>>) attributes {dimension_semantics = [#tpu.dimension_semantics<parallel>], iteration_bounds = array<i64: 2>, scalar_prefetch = 0 : i64, scratch_operands = 0 : i64, tpu.core_type = #tpu.core_type<tc>, window_params = [{transform_indices = @transform_0, window_bounds = array<i64: 1, 8, 32>}, {transform_indices = @transform_1, window_bounds = array<i64: 1, 8, 8>}, {transform_indices = @transform_2, window_bounds = array<i64: 1, 64, 4>}, {pipeline_mode = #tpu.pipeline_mode<synchronous>, transform_indices = @transform_3, window_bounds = array<i64: 3, 32, 64>}, {pipeline_mode = #tpu.pipeline_mode<synchronous>, transform_indices = @transform_4, window_bounds = array<i64: 3, 4, 32>}, {pipeline_mode = #tpu.pipeline_mode<synchronous>, transform_indices = @transform_5, window_bounds = array<i64: 3, 4, 32>}, {pipeline_mode = #tpu.pipeline_mode<synchronous>, transform_indices = @transform_6, window_bounds = array<i64: 33, 128>}, {transform_indices = @transform_7, window_bounds = array<i64: 1, 8, 128>}]} {
    %c0 = arith.constant 0 : index
    %c0_0 = arith.constant 0 : index
    %c0_1 = arith.constant 0 : index
    %0 = vector.load %arg2[%c0, %c0_0, %c0_1] : memref<1x8x8xbf16, #tpu.memory_space<vmem>>, vector<1x8x8xbf16>
    %1 = vector.shape_cast %0 : vector<1x8x8xbf16> to vector<8x8xbf16>
    %2 = arith.extf %1 : vector<8x8xbf16> to vector<8x8xf32>
    %c0_2 = arith.constant 0 : index
    %c0_3 = arith.constant 0 : index
    %c0_4 = arith.constant 0 : index
    %3 = vector.load %arg3[%c0_2, %c0_3, %c0_4] : memref<1x64x4xbf16, #tpu.memory_space<vmem>>, vector<1x64x4xbf16>
    %4 = vector.shape_cast %3 : vector<1x64x4xbf16> to vector<64x4xbf16>
    %c0_5 = arith.constant 0 : index
    %c0_6 = arith.constant 0 : index
    %c0_7 = arith.constant 0 : index
    %5 = vector.load %arg1[%c0_5, %c0_6, %c0_7] : memref<1x8x32xbf16, #tpu.memory_space<vmem>>, vector<1x8x32xbf16>
    %6 = vector.shape_cast %5 : vector<1x8x32xbf16> to vector<8x32xbf16>
    %c0_8 = arith.constant 0 : index
    %c0_9 = arith.constant 0 : index
    %c0_10 = arith.constant 0 : index
    %7 = vector.load %arg4[%c0_8, %c0_9, %c0_10] : memref<3x32x64xbf16, #tpu.memory_space<vmem>>, vector<1x32x64xbf16>
    %8 = vector.shape_cast %7 : vector<1x32x64xbf16> to vector<32x64xbf16>
    %cst = arith.constant dense<0.000000e+00> : vector<8x64xf32>
    %9 = tpu.matmul %6, %8, %cst {dimension_numbers = #tpu.dot_dimension_numbers<[1], [0], [0], [1], [0, 0, 1, 1], [], []>} : vector<8x32xbf16>, vector<32x64xbf16>, vector<8x64xf32> -> vector<8x64xf32>
    %c0_11 = arith.constant 0 : index
    %c0_12 = arith.constant 0 : index
    %c0_13 = arith.constant 0 : index
    %10 = vector.load %arg6[%c0_11, %c0_12, %c0_13] : memref<3x4x32xf32, #tpu.memory_space<vmem>>, vector<1x4x32xf32>
    %11 = vector.shape_cast %10 : vector<1x4x32xf32> to vector<4x32xf32>
    %12 = vector.extract_strided_slice %9 {offsets = [0, 0], sizes = [8, 32], strides = [1, 1]} : vector<8x64xf32> to vector<8x32xf32>
    %13 = vector.extract_strided_slice %11 {offsets = [0, 0], sizes = [1, 32], strides = [1, 1]} : vector<4x32xf32> to vector<1x32xf32>
    %14 = vector.broadcast %13 : vector<1x32xf32> to vector<8x32xf32>
    %15 = arith.addf %12, %14 : vector<8x32xf32>
    %16 = vector.extract_strided_slice %9 {offsets = [0, 32], sizes = [8, 32], strides = [1, 1]} : vector<8x64xf32> to vector<8x32xf32>
    %17 = vector.extract_strided_slice %11 {offsets = [1, 0], sizes = [1, 32], strides = [1, 1]} : vector<4x32xf32> to vector<1x32xf32>
    %18 = vector.broadcast %17 : vector<1x32xf32> to vector<8x32xf32>
    %19 = arith.addf %16, %18 : vector<8x32xf32>
    %20 = vector.extract_strided_slice %11 {offsets = [2, 0], sizes = [1, 32], strides = [1, 1]} : vector<4x32xf32> to vector<1x32xf32>
    %21 = vector.extract_strided_slice %11 {offsets = [3, 0], sizes = [1, 32], strides = [1, 1]} : vector<4x32xf32> to vector<1x32xf32>
    %c0_14 = arith.constant 0 : index
    %c0_15 = arith.constant 0 : index
    %c0_16 = arith.constant 0 : index
    %22 = vector.load %arg5[%c0_14, %c0_15, %c0_16] : memref<3x4x32xbf16, #tpu.memory_space<vmem>>, vector<1x4x32xbf16>
    %23 = vector.shape_cast %22 : vector<1x4x32xbf16> to vector<4x32xbf16>
    %cst_17 = arith.constant dense<0.000000e+00> : vector<64x32xf32>
    %24 = tpu.matmul %4, %23, %cst_17 {dimension_numbers = #tpu.dot_dimension_numbers<[1], [0], [0], [1], [0, 0, 1, 1], [], []>} : vector<64x4xbf16>, vector<4x32xbf16>, vector<64x32xf32> -> vector<64x32xf32>
    %25 = vector.shape_cast %24 : vector<64x32xf32> to vector<8x8x32xf32>
    %26 = vector.shape_cast %19 : vector<8x32xf32> to vector<8x1x32xf32>
    %27 = vector.shape_cast %15 : vector<8x32xf32> to vector<1x8x32xf32>
    %28 = vector.broadcast %26 : vector<8x1x32xf32> to vector<8x8x32xf32>
    %29 = vector.broadcast %27 : vector<1x8x32xf32> to vector<8x8x32xf32>
    %30 = arith.addf %28, %29 : vector<8x8x32xf32>
    %31 = arith.addf %30, %25 : vector<8x8x32xf32>
    %cst_18 = arith.constant 2.000000e-01 : f32
    %32 = vector.broadcast %cst_18 : f32 to vector<8x8x32xf32>
    %33 = arith.mulf %32, %31 : vector<8x8x32xf32>
    %34 = arith.maximumf %31, %33 : vector<8x8x32xf32>
    %35 = vector.shape_cast %20 : vector<1x32xf32> to vector<1x1x32xf32>
    %36 = vector.broadcast %35 : vector<1x1x32xf32> to vector<8x8x32xf32>
    %37 = arith.mulf %34, %36 : vector<8x8x32xf32>
    %cst_19 = arith.constant dense<0.000000e+00> : vector<8x8xf32>
    %38 = vector.multi_reduction <add>, %37, %cst_19 [2] : vector<8x8x32xf32> to vector<8x8xf32>
    %39 = arith.addf %38, %2 : vector<8x8xf32>
    %cst_20 = arith.constant dense<0xFF800000> : vector<8xf32>
    %40 = vector.multi_reduction <maximumf>, %39, %cst_20 [1] : vector<8x8xf32> to vector<8xf32>
    %41 = vector.shape_cast %40 : vector<8xf32> to vector<8x1xf32>
    %42 = vector.broadcast %41 : vector<8x1xf32> to vector<8x8xf32>
    %43 = arith.subf %39, %42 : vector<8x8xf32>
    %44 = math.exp %43 : vector<8x8xf32>
    %cst_21 = arith.constant dense<0.000000e+00> : vector<8xf32>
    %45 = vector.multi_reduction <add>, %44, %cst_21 [1] : vector<8x8xf32> to vector<8xf32>
    %46 = vector.shape_cast %45 : vector<8xf32> to vector<8x1xf32>
    %47 = tpu.reciprocal %46 {approx = true} : vector<8x1xf32> -> vector<8x1xf32>
    %48 = vector.broadcast %47 : vector<8x1xf32> to vector<8x8xf32>
    %49 = arith.mulf %44, %48 : vector<8x8xf32>
    %cst_22 = arith.constant dense<0.000000e+00> : vector<8x32xf32>
    %50 = tpu.matmul %49, %15, %cst_22 {dimension_numbers = #tpu.dot_dimension_numbers<[1], [0], [0], [1], [0, 0, 1, 1], [], []>} : vector<8x8xf32>, vector<8x32xf32>, vector<8x32xf32> -> vector<8x32xf32>
    %51 = vector.broadcast %21 : vector<1x32xf32> to vector<8x32xf32>
    %52 = arith.addf %50, %51 : vector<8x32xf32>
    %cst_23 = arith.constant 0.000000e+00 : f32
    %53 = vector.broadcast %cst_23 : f32 to vector<8x32xf32>
    %54 = arith.maximumf %52, %53 : vector<8x32xf32>
    %55 = arith.truncf %54 : vector<8x32xf32> to vector<8x32xbf16>
    %c1 = arith.constant 1 : index
    %c0_24 = arith.constant 0 : index
    %c0_25 = arith.constant 0 : index
    %56 = vector.load %arg4[%c1, %c0_24, %c0_25] : memref<3x32x64xbf16, #tpu.memory_space<vmem>>, vector<1x32x64xbf16>
    %57 = vector.shape_cast %56 : vector<1x32x64xbf16> to vector<32x64xbf16>
    %cst_26 = arith.constant dense<0.000000e+00> : vector<8x64xf32>
    %58 = tpu.matmul %55, %57, %cst_26 {dimension_numbers = #tpu.dot_dimension_numbers<[1], [0], [0], [1], [0, 0, 1, 1], [], []>} : vector<8x32xbf16>, vector<32x64xbf16>, vector<8x64xf32> -> vector<8x64xf32>
    %c1_27 = arith.constant 1 : index
    %c0_28 = arith.constant 0 : index
    %c0_29 = arith.constant 0 : index
    %59 = vector.load %arg6[%c1_27, %c0_28, %c0_29] : memref<3x4x32xf32, #tpu.memory_space<vmem>>, vector<1x4x32xf32>
    %60 = vector.shape_cast %59 : vector<1x4x32xf32> to vector<4x32xf32>
    %61 = vector.extract_strided_slice %58 {offsets = [0, 0], sizes = [8, 32], strides = [1, 1]} : vector<8x64xf32> to vector<8x32xf32>
    %62 = vector.extract_strided_slice %60 {offsets = [0, 0], sizes = [1, 32], strides = [1, 1]} : vector<4x32xf32> to vector<1x32xf32>
    %63 = vector.broadcast %62 : vector<1x32xf32> to vector<8x32xf32>
    %64 = arith.addf %61, %63 : vector<8x32xf32>
    %65 = vector.extract_strided_slice %58 {offsets = [0, 32], sizes = [8, 32], strides = [1, 1]} : vector<8x64xf32> to vector<8x32xf32>
    %66 = vector.extract_strided_slice %60 {offsets = [1, 0], sizes = [1, 32], strides = [1, 1]} : vector<4x32xf32> to vector<1x32xf32>
    %67 = vector.broadcast %66 : vector<1x32xf32> to vector<8x32xf32>
    %68 = arith.addf %65, %67 : vector<8x32xf32>
    %69 = vector.extract_strided_slice %60 {offsets = [2, 0], sizes = [1, 32], strides = [1, 1]} : vector<4x32xf32> to vector<1x32xf32>
    %70 = vector.extract_strided_slice %60 {offsets = [3, 0], sizes = [1, 32], strides = [1, 1]} : vector<4x32xf32> to vector<1x32xf32>
    %c1_30 = arith.constant 1 : index
    %c0_31 = arith.constant 0 : index
    %c0_32 = arith.constant 0 : index
    %71 = vector.load %arg5[%c1_30, %c0_31, %c0_32] : memref<3x4x32xbf16, #tpu.memory_space<vmem>>, vector<1x4x32xbf16>
    %72 = vector.shape_cast %71 : vector<1x4x32xbf16> to vector<4x32xbf16>
    %cst_33 = arith.constant dense<0.000000e+00> : vector<64x32xf32>
    %73 = tpu.matmul %4, %72, %cst_33 {dimension_numbers = #tpu.dot_dimension_numbers<[1], [0], [0], [1], [0, 0, 1, 1], [], []>} : vector<64x4xbf16>, vector<4x32xbf16>, vector<64x32xf32> -> vector<64x32xf32>
    %74 = vector.shape_cast %73 : vector<64x32xf32> to vector<8x8x32xf32>
    %75 = vector.shape_cast %68 : vector<8x32xf32> to vector<8x1x32xf32>
    %76 = vector.shape_cast %64 : vector<8x32xf32> to vector<1x8x32xf32>
    %77 = vector.broadcast %75 : vector<8x1x32xf32> to vector<8x8x32xf32>
    %78 = vector.broadcast %76 : vector<1x8x32xf32> to vector<8x8x32xf32>
    %79 = arith.addf %77, %78 : vector<8x8x32xf32>
    %80 = arith.addf %79, %74 : vector<8x8x32xf32>
    %cst_34 = arith.constant 2.000000e-01 : f32
    %81 = vector.broadcast %cst_34 : f32 to vector<8x8x32xf32>
    %82 = arith.mulf %81, %80 : vector<8x8x32xf32>
    %83 = arith.maximumf %80, %82 : vector<8x8x32xf32>
    %84 = vector.shape_cast %69 : vector<1x32xf32> to vector<1x1x32xf32>
    %85 = vector.broadcast %84 : vector<1x1x32xf32> to vector<8x8x32xf32>
    %86 = arith.mulf %83, %85 : vector<8x8x32xf32>
    %cst_35 = arith.constant dense<0.000000e+00> : vector<8x8xf32>
    %87 = vector.multi_reduction <add>, %86, %cst_35 [2] : vector<8x8x32xf32> to vector<8x8xf32>
    %88 = arith.addf %87, %2 : vector<8x8xf32>
    %cst_36 = arith.constant dense<0xFF800000> : vector<8xf32>
    %89 = vector.multi_reduction <maximumf>, %88, %cst_36 [1] : vector<8x8xf32> to vector<8xf32>
    %90 = vector.shape_cast %89 : vector<8xf32> to vector<8x1xf32>
    %91 = vector.broadcast %90 : vector<8x1xf32> to vector<8x8xf32>
    %92 = arith.subf %88, %91 : vector<8x8xf32>
    %93 = math.exp %92 : vector<8x8xf32>
    %cst_37 = arith.constant dense<0.000000e+00> : vector<8xf32>
    %94 = vector.multi_reduction <add>, %93, %cst_37 [1] : vector<8x8xf32> to vector<8xf32>
    %95 = vector.shape_cast %94 : vector<8xf32> to vector<8x1xf32>
    %96 = tpu.reciprocal %95 {approx = true} : vector<8x1xf32> -> vector<8x1xf32>
    %97 = vector.broadcast %96 : vector<8x1xf32> to vector<8x8xf32>
    %98 = arith.mulf %93, %97 : vector<8x8xf32>
    %cst_38 = arith.constant dense<0.000000e+00> : vector<8x32xf32>
    %99 = tpu.matmul %98, %64, %cst_38 {dimension_numbers = #tpu.dot_dimension_numbers<[1], [0], [0], [1], [0, 0, 1, 1], [], []>} : vector<8x8xf32>, vector<8x32xf32>, vector<8x32xf32> -> vector<8x32xf32>
    %100 = vector.broadcast %70 : vector<1x32xf32> to vector<8x32xf32>
    %101 = arith.addf %99, %100 : vector<8x32xf32>
    %cst_39 = arith.constant 0.000000e+00 : f32
    %102 = vector.broadcast %cst_39 : f32 to vector<8x32xf32>
    %103 = arith.maximumf %101, %102 : vector<8x32xf32>
    %104 = arith.truncf %103 : vector<8x32xf32> to vector<8x32xbf16>
    %c2 = arith.constant 2 : index
    %c0_40 = arith.constant 0 : index
    %c0_41 = arith.constant 0 : index
    %105 = vector.load %arg4[%c2, %c0_40, %c0_41] : memref<3x32x64xbf16, #tpu.memory_space<vmem>>, vector<1x32x64xbf16>
    %106 = vector.shape_cast %105 : vector<1x32x64xbf16> to vector<32x64xbf16>
    %cst_42 = arith.constant dense<0.000000e+00> : vector<8x64xf32>
    %107 = tpu.matmul %104, %106, %cst_42 {dimension_numbers = #tpu.dot_dimension_numbers<[1], [0], [0], [1], [0, 0, 1, 1], [], []>} : vector<8x32xbf16>, vector<32x64xbf16>, vector<8x64xf32> -> vector<8x64xf32>
    %c2_43 = arith.constant 2 : index
    %c0_44 = arith.constant 0 : index
    %c0_45 = arith.constant 0 : index
    %108 = vector.load %arg6[%c2_43, %c0_44, %c0_45] : memref<3x4x32xf32, #tpu.memory_space<vmem>>, vector<1x4x32xf32>
    %109 = vector.shape_cast %108 : vector<1x4x32xf32> to vector<4x32xf32>
    %110 = vector.extract_strided_slice %107 {offsets = [0, 0], sizes = [8, 32], strides = [1, 1]} : vector<8x64xf32> to vector<8x32xf32>
    %111 = vector.extract_strided_slice %109 {offsets = [0, 0], sizes = [1, 32], strides = [1, 1]} : vector<4x32xf32> to vector<1x32xf32>
    %112 = vector.broadcast %111 : vector<1x32xf32> to vector<8x32xf32>
    %113 = arith.addf %110, %112 : vector<8x32xf32>
    %114 = vector.extract_strided_slice %107 {offsets = [0, 32], sizes = [8, 32], strides = [1, 1]} : vector<8x64xf32> to vector<8x32xf32>
    %115 = vector.extract_strided_slice %109 {offsets = [1, 0], sizes = [1, 32], strides = [1, 1]} : vector<4x32xf32> to vector<1x32xf32>
    %116 = vector.broadcast %115 : vector<1x32xf32> to vector<8x32xf32>
    %117 = arith.addf %114, %116 : vector<8x32xf32>
    %118 = vector.extract_strided_slice %109 {offsets = [2, 0], sizes = [1, 32], strides = [1, 1]} : vector<4x32xf32> to vector<1x32xf32>
    %119 = vector.extract_strided_slice %109 {offsets = [3, 0], sizes = [1, 32], strides = [1, 1]} : vector<4x32xf32> to vector<1x32xf32>
    %c2_46 = arith.constant 2 : index
    %c0_47 = arith.constant 0 : index
    %c0_48 = arith.constant 0 : index
    %120 = vector.load %arg5[%c2_46, %c0_47, %c0_48] : memref<3x4x32xbf16, #tpu.memory_space<vmem>>, vector<1x4x32xbf16>
    %121 = vector.shape_cast %120 : vector<1x4x32xbf16> to vector<4x32xbf16>
    %cst_49 = arith.constant dense<0.000000e+00> : vector<64x32xf32>
    %122 = tpu.matmul %4, %121, %cst_49 {dimension_numbers = #tpu.dot_dimension_numbers<[1], [0], [0], [1], [0, 0, 1, 1], [], []>} : vector<64x4xbf16>, vector<4x32xbf16>, vector<64x32xf32> -> vector<64x32xf32>
    %123 = vector.shape_cast %122 : vector<64x32xf32> to vector<8x8x32xf32>
    %124 = vector.shape_cast %117 : vector<8x32xf32> to vector<8x1x32xf32>
    %125 = vector.shape_cast %113 : vector<8x32xf32> to vector<1x8x32xf32>
    %126 = vector.broadcast %124 : vector<8x1x32xf32> to vector<8x8x32xf32>
    %127 = vector.broadcast %125 : vector<1x8x32xf32> to vector<8x8x32xf32>
    %128 = arith.addf %126, %127 : vector<8x8x32xf32>
    %129 = arith.addf %128, %123 : vector<8x8x32xf32>
    %cst_50 = arith.constant 2.000000e-01 : f32
    %130 = vector.broadcast %cst_50 : f32 to vector<8x8x32xf32>
    %131 = arith.mulf %130, %129 : vector<8x8x32xf32>
    %132 = arith.maximumf %129, %131 : vector<8x8x32xf32>
    %133 = vector.shape_cast %118 : vector<1x32xf32> to vector<1x1x32xf32>
    %134 = vector.broadcast %133 : vector<1x1x32xf32> to vector<8x8x32xf32>
    %135 = arith.mulf %132, %134 : vector<8x8x32xf32>
    %cst_51 = arith.constant dense<0.000000e+00> : vector<8x8xf32>
    %136 = vector.multi_reduction <add>, %135, %cst_51 [2] : vector<8x8x32xf32> to vector<8x8xf32>
    %137 = arith.addf %136, %2 : vector<8x8xf32>
    %cst_52 = arith.constant dense<0xFF800000> : vector<8xf32>
    %138 = vector.multi_reduction <maximumf>, %137, %cst_52 [1] : vector<8x8xf32> to vector<8xf32>
    %139 = vector.shape_cast %138 : vector<8xf32> to vector<8x1xf32>
    %140 = vector.broadcast %139 : vector<8x1xf32> to vector<8x8xf32>
    %141 = arith.subf %137, %140 : vector<8x8xf32>
    %142 = math.exp %141 : vector<8x8xf32>
    %cst_53 = arith.constant dense<0.000000e+00> : vector<8xf32>
    %143 = vector.multi_reduction <add>, %142, %cst_53 [1] : vector<8x8xf32> to vector<8xf32>
    %144 = vector.shape_cast %143 : vector<8xf32> to vector<8x1xf32>
    %145 = tpu.reciprocal %144 {approx = true} : vector<8x1xf32> -> vector<8x1xf32>
    %146 = vector.broadcast %145 : vector<8x1xf32> to vector<8x8xf32>
    %147 = arith.mulf %142, %146 : vector<8x8xf32>
    %cst_54 = arith.constant dense<0.000000e+00> : vector<8x32xf32>
    %148 = tpu.matmul %147, %113, %cst_54 {dimension_numbers = #tpu.dot_dimension_numbers<[1], [0], [0], [1], [0, 0, 1, 1], [], []>} : vector<8x8xf32>, vector<8x32xf32>, vector<8x32xf32> -> vector<8x32xf32>
    %149 = vector.broadcast %119 : vector<1x32xf32> to vector<8x32xf32>
    %150 = arith.addf %148, %149 : vector<8x32xf32>
    %cst_55 = arith.constant 0.000000e+00 : f32
    %151 = vector.broadcast %cst_55 : f32 to vector<8x32xf32>
    %152 = arith.maximumf %150, %151 : vector<8x32xf32>
    %153 = arith.truncf %152 : vector<8x32xf32> to vector<8x32xbf16>
    %154 = arith.extf %153 : vector<8x32xbf16> to vector<8x32xf32>
    %cst_56 = arith.constant dense<0.000000e+00> : vector<32xf32>
    %155 = vector.multi_reduction <add>, %154, %cst_56 [0] : vector<8x32xf32> to vector<32xf32>
    %156 = vector.shape_cast %155 : vector<32xf32> to vector<1x32xf32>
    %cst_57 = arith.constant 8.000000e+00 : f32
    %157 = vector.broadcast %cst_57 : f32 to vector<1x32xf32>
    %158 = arith.divf %156, %157 : vector<1x32xf32>
    %c0_58 = arith.constant 0 : index
    %c0_59 = arith.constant 0 : index
    %159 = vector.load %arg7[%c0_58, %c0_59] : memref<33x128xf32, #tpu.memory_space<vmem>>, vector<33x128xf32>
    %160 = vector.extract_strided_slice %159 {offsets = [0, 0], sizes = [32, 128], strides = [1, 1]} : vector<33x128xf32> to vector<32x128xf32>
    %cst_60 = arith.constant dense<0.000000e+00> : vector<1x128xf32>
    %161 = tpu.matmul %158, %160, %cst_60 {dimension_numbers = #tpu.dot_dimension_numbers<[1], [0], [0], [1], [0, 0, 1, 1], [], []>} : vector<1x32xf32>, vector<32x128xf32>, vector<1x128xf32> -> vector<1x128xf32>
    %162 = vector.extract_strided_slice %159 {offsets = [32, 0], sizes = [1, 128], strides = [1, 1]} : vector<33x128xf32> to vector<1x128xf32>
    %163 = arith.addf %161, %162 : vector<1x128xf32>
    %164 = vector.shape_cast %163 : vector<1x128xf32> to vector<1x1x128xf32>
    %165 = vector.shape_cast %164 : vector<1x1x128xf32> to vector<1x1x128xf32>
    %166 = vector.broadcast %165 : vector<1x1x128xf32> to vector<1x8x128xf32>
    %c0_61 = arith.constant 0 : index
    %c0_62 = arith.constant 0 : index
    %c0_63 = arith.constant 0 : index
    %167 = vector.load %arg8[%c0_61, %c0_62, %c0_63] : memref<1x8x128xf32, #tpu.memory_space<vmem>>, vector<1x8x128xf32>
    tpu.vector_store %arg8[%c0_61, %c0_62, %c0_63], %166 {strides = array<i32>} : memref<1x8x128xf32, #tpu.memory_space<vmem>>, vector<1x8x128xf32>,
    return
  }
  func.func @transform_0(%arg0: i32) -> (i32, i32, i32) {
    %c0_i32 = arith.constant 0 : i32
    %c0_i32_0 = arith.constant 0 : i32
    %c0_i32_1 = arith.constant 0 : i32
    return %arg0, %c0_i32, %c0_i32_0 : i32, i32, i32
  }
  func.func @transform_1(%arg0: i32) -> (i32, i32, i32) {
    %c0_i32 = arith.constant 0 : i32
    %c0_i32_0 = arith.constant 0 : i32
    %c0_i32_1 = arith.constant 0 : i32
    return %arg0, %c0_i32, %c0_i32_0 : i32, i32, i32
  }
  func.func @transform_2(%arg0: i32) -> (i32, i32, i32) {
    %c0_i32 = arith.constant 0 : i32
    %c0_i32_0 = arith.constant 0 : i32
    %c0_i32_1 = arith.constant 0 : i32
    return %arg0, %c0_i32, %c0_i32_0 : i32, i32, i32
  }
  func.func @transform_3(%arg0: i32) -> (i32, i32, i32) {
    %c0_i32 = arith.constant 0 : i32
    %c0_i32_0 = arith.constant 0 : i32
    %c0_i32_1 = arith.constant 0 : i32
    %c0_i32_2 = arith.constant 0 : i32
    return %c0_i32, %c0_i32_0, %c0_i32_1 : i32, i32, i32
  }
  func.func @transform_4(%arg0: i32) -> (i32, i32, i32) {
    %c0_i32 = arith.constant 0 : i32
    %c0_i32_0 = arith.constant 0 : i32
    %c0_i32_1 = arith.constant 0 : i32
    %c0_i32_2 = arith.constant 0 : i32
    return %c0_i32, %c0_i32_0, %c0_i32_1 : i32, i32, i32
  }
  func.func @transform_5(%arg0: i32) -> (i32, i32, i32) {
    %c0_i32 = arith.constant 0 : i32
    %c0_i32_0 = arith.constant 0 : i32
    %c0_i32_1 = arith.constant 0 : i32
    %c0_i32_2 = arith.constant 0 : i32
    return %c0_i32, %c0_i32_0, %c0_i32_1 : i32, i32, i32
  }
  func.func @transform_6(%arg0: i32) -> (i32, i32) {
    %c0_i32 = arith.constant 0 : i32
    %c0_i32_0 = arith.constant 0 : i32
    %c0_i32_1 = arith.constant 0 : i32
    return %c0_i32, %c0_i32_0 : i32, i32
  }
  func.func @transform_7(%arg0: i32) -> (i32, i32, i32) {
    %c0_i32 = arith.constant 0 : i32
    %c0_i32_0 = arith.constant 0 : i32
    %c0_i32_1 = arith.constant 0 : i32
    return %arg0, %c0_i32, %c0_i32_0 : i32, i32, i32
  }
}

</mosaic_0001>

<bundles_post_ra>
// kernel: _gatv2_forward.1
= control target key start
LH: loop header
LB: loop body
LE: loop exit
PB: predicated region body
PF: predicated region fallthrough
CT: control target
= control target key end

     0   :  { %s4297_s0 = inlined_call_operand.vmem [shape: bf16[2,8,32], index: 0, kind: input, shape index: {}]   ;;  %s4298_s1 = inlined_call_operand.hbm [shape: bf16[2,8,8], index: 1, kind: input, shape index: {}]   ;;  %s4299_s2 = inlined_call_operand.vmem [shape: bf16[2,64,4], index: 2, kind: input, shape index: {}]   ;;  %s4300_s3 = inlined_call_operand.vmem [shape: bf16[3,32,64], index: 3, kind: input, shape index: {}]   ;;  %s4301_s4 = inlined_call_operand.vmem [shape: bf16[3,4,32], index: 4, kind: input, shape index: {}]   ;;  %s4302_s5 = inlined_call_operand.vmem [shape: f32[3,4,32], index: 5, kind: input, shape index: {}]   ;;  %s4303_s6 = inlined_call_operand.hbm [shape: f32[33,128], index: 6, kind: input, shape index: {}]   ;;  %s4304_s7 = inlined_call_operand.hbm [shape: f32[2,8,128], index: 7, kind: output, shape index: {}]  }
   0x1   :  { %4309 = sst [smem:[#allocation12_spill]] %s4303_s6 }
   0x2   :  { %12 = vsyncpa [#allocation3], 0 }
   0x3   :  { %14 = vsyncpa [#allocation3 + $0x1], 0 }
   0x4   :  { %15 = vsyncpa [#allocation6], 0 }
   0x5   :  { %16 = vsyncpa [#allocation4], 0 }
   0x6   :  { %18 = vsyncpa [#allocation4 + $0x1], 0  ;;  %s3557_s24 = smov 0   ;;  %s3559_s25 = smov 0  }
   0x7   :  { %s3561_s26 = smov 0   ;;  %s3563_s27 = smov 0  }
   0x8 LB: > { %s3578_s28 = sadd.s32 4294967295, %s3504_s27   ;;  %s3070_s29 = sadd.s32 4294967294, %s3504_s27   ;;  %s3504_s27 = sphi %s3563_s27, %s4330_s27   ;;  %s3500_s26 = sphi %s3561_s26, %s4329_s26   ;;  %s3496_s25 = sphi %s3559_s25, %s4328_s25   ;;  %s3492_s24 = sphi %s3557_s24, %s4327_s24  }
   0x9   : > { %p70_p0 = scmp.ne.s32.totalorder %s3496_s25, %s3492_s24  ;;  %p4305_p1 = scmp.eq.s32.totalorder %s3578_s28, 0 }
   0xa   : > { %p210_p3 = scmp.eq.s32.totalorder %s3070_s29, 1  ;;  %p3071_p5 = scmp.ge.s32.totalorder %s3504_s27, 1 }
   0xb   : > { %p3587_p4 = por %p4305_p1, %p70_p0  ;;  %p217_p7 = scmp.lt.s32.totalorder %s3504_s27, 3 }
   0xc   : > { %p3592_p6 = por %p210_p3, %p70_p0  ;;  %s3506_s10 = smov [#allocation5]  }
   0xd   : > { %s4310_s30 = scalar_select %p3587_p4, 1, 0 }
   0xe   : > { %s4311_s8 = scalar_select %p3592_p6, 1, 0 }
   0xf   : > { %p3597_p8 = pnand %p3071_p5, %p217_p7  ;;  %s238_s11 = sshll.u32 %s3506_s10, 4  ;;  %s239_s11 = int_to_ptr.vmem [resolvable:$true] %s238_s11 }
  0x10   : > { %s3611_s13 = sadd.s32 1, %s3504_s27   ;;  %s57_s14 = sadd.s32 1, %s3500_s26 }
  0x11   : > { %s4312_s9 = scalar_select %p3597_p8, 1, 0 }
  0x12   : > { %p3255_p9 = pneg %p3597_p8  ;;  %s54_s15 = ssub.s32 %s3504_s27, %s3611_s13 }
  0x13   : > { %s3393_s16 = scalar_lea.vmem %s239_s11, 640  ;;  %p3401_p5 = scmp.lt.s32.totalorder %s239_s11, %s239_s11 }
  0x14   : > { %p3606_p11 = pnand %p3255_p9, %p4305_p1  ;;  %p3394_p13 = scmp.ne.s32.totalorder %s239_s11, %s3393_s16 }
  0x15   : > { %p3402_p7 = scmp.lt.s32.totalorder %s3393_s16, %s3393_s16 }
  0x16   : > { %p3384_p12 = pneg %p3606_p11 }
  0x17   : > { %p3403_p10 = por %p3402_p7, %p3401_p5 }
  0x18   : > { %p3396_p0 = pnand %p3394_p13, %p3384_p12 }
  0x1a   : > { %p3397_p3 = pneg %p3396_p0 }
  0x1c   : > { %p3404_p2 = pnand %p3403_p10, %p3397_p3 }
  0x1e   : > { %3407 = shalt.err (!%p3404_p2)
}
  0x1f   : > { %s3507_s17 = smov 128   ;;  %s3508_s18 = smov 8  }
  0x20   : > { %s4314_s6 = sld [smem:[#allocation12_spill]]  ;;  %p55_p9 = scmp.eq.s32.totalorder %s54_s15, 0 }
  0x21   : > { %p64_p12 = scmp.ne.s32.totalorder %s3500_s26, %s3496_s25  ;;  %p65_p10 = scmp.eq.s32.totalorder %s3504_s27, 0 }
  0x22   : > { %p3268_p2 = scmp.lt.s32.totalorder %s3504_s27, 2  ;;  %p4316_p0 = scmp.eq.s32.totalorder %s3578_s28, 1 }
  0x23   : > { %s3628_s21 = scalar_select %p55_p9, %s3500_s26, %s57_s14  }
  0x24   : > { %p66_p13 = por %p65_p10, %p64_p12  ;;  %p3632_p3 = por %p4316_p0, %p64_p12 }
  0x25   : > { %4315 = sst [smem:[#allocation11_spill]] %s3628_s21  ;;  %s259_s23 = sand.u32 1, %s3500_s26  }
  0x26   : > { %3258 = dma.hbm_to_vmem [thread:$0]  (!%p3606_p11), %s4314_s6, 640, %s239_s11, [#allocation6], %s3507_s17, %s3507_s17, %s3508_s18  }
  0x27   : > { %s4317_s22 = scalar_select %p3632_p3, 1, 0 }
  0x28   : > { %s3075_s29 = sshll.u32 %s3504_s27, 6  ;;  %s3074_s10 = sshll.u32 %s259_s23, 2 }
  0x29   : > { %s3641_s19 = scalar_lea.hbm %s4298_s1, %s3075_s29  ;;  %s263_s11 = scalar_lea.vmem [#allocation2], %s3074_s10 }
  0x2a   : > { %s270_s14 = sshll.u32 %s263_s11, 4  ;;  %p3643_p11 = pnand %p3268_p2, %p66_p13  ;;  %s271_s14 = int_to_ptr.vmem [resolvable:$true] %s270_s14 }
  0x2b   : > { %s260_s17 = scalar_lea.sflag [#allocation3], %s259_s23  ;;  %s3408_s18 = scalar_lea.hbm %s3641_s19, 64 }
  0x2c   : > { %p3409_p5 = scmp.ne.s32.totalorder %s3641_s19, %s3408_s18  ;;  %p3410_p7 = pneg %p3643_p11 }
  0x2d   : > { %s3413_s12 = scalar_lea.hbm %s4298_s1, 128  ;;  %p3414_p10 = scmp.lt.s32.totalorder %s3641_s19, %s4298_s1 }
  0x2e   : > { %p3411_p9 = pnand %p3410_p7, %p3409_p5  ;;  %p3415_p2 = scmp.lt.s32.totalorder %s3413_s12, %s3408_s18 }
  0x30   : > { %p3412_p12 = pneg %p3411_p9  ;;  %p3416_p13 = por %p3415_p2, %p3414_p10 }
  0x32   : > { %p3417_p0 = pnand %p3416_p13, %p3412_p12 }
  0x34   : > { %3420 = shalt.err (!%p3417_p0)
}
  0x35   : > { %s3421_s11 = scalar_lea.vmem %s271_s14, 64  ;;  %s3509_s23 = smov [#allocation2]  }
  0x36   : > { %p3422_p1 = scmp.ne.s32.totalorder %s271_s14, %s3421_s11  ;;  %s3426_s6 = sshll.u32 %s3509_s23, 4  ;;  %s3427_s6 = int_to_ptr.vmem [resolvable:$false] %s3426_s6 }
  0x37   : > { %s3428_s21 = scalar_lea.vmem %s3427_s6, 128  ;;  %p3429_p5 = scmp.lt.s32.totalorder %s271_s14, %s3427_s6 }
  0x38   : > { %p3424_p6 = pnand %p3422_p1, %p3410_p7  ;;  %p3430_p9 = scmp.lt.s32.totalorder %s3428_s21, %s3421_s11 }
  0x3a   : > { %p3425_p3 = pneg %p3424_p6  ;;  %p3431_p4 = por %p3430_p9, %p3429_p5 }
  0x3c   : > { %p3432_p8 = pnand %p3431_p4, %p3425_p3 }
  0x3e   : > { %3435 = shalt.err (!%p3432_p8)
}
  0x3f   : > { %3262 = dma.hbm_to_vmem [thread:$0]  (!%p3643_p11), %s3641_s19, 64, %s271_s14, %s260_s17  }
  0x40   : > { %p4319_p12 = scmp.ne.s32.totalorder %s4312_s9, 0 }
  0x41   : > { %s3664_s18 = sand.u32 (!%p4319_p12), 1, %s3496_s25   ;;  %p4320_p1 = scmp.ne.s32.totalorder (!%p4319_p12), %s4310_s30, 0 }
  0x42   : > { %287 = sbr.rel (%p4319_p12) target bundleno = 4936 (0x1348), region = 48  ;;  %s3077_s20 = sshll.u32 (!%p4319_p12), %s3664_s18, 2 }
  0x43   : > { %s290_s29 = scalar_lea.sflag (!%p4319_p12), [#allocation3], %s3664_s18  ;;  %s3668_s6 = scalar_lea.vmem (!%p4319_p12), [#allocation2], %s3077_s20 }
  0x47   : > { %3479 = dma.done.wait (%p4320_p1), %s290_s29, 64  }
  0x48   : > { %3481 = vsyncadd (%p4320_p1), %s290_s29, 4294967232  ;;  %p4321_p4 = scmp.eq.s32.totalorder %s3578_s28, 0 }
  0x4a   : > { %3483 = dma.done.wait (%p4321_p4), [#allocation6], 640   ;;  %p4322_p6 = pmov %p4321_p4 }
  0x4b   : > { %p337_p8 = scmp.lt.s32.totalorder %s3578_s28, 1  ;;  %v3510_v0 = vmov 0.0   ;;  %vm3511_vm0 = vmmov 0   ;;  %v419_v1 = vlaneseq  ;;  %vm467_vm1 = vcmask 1041408   ;;  %v433_v3 = vld [vmem:[%s4301_s4] sm:$0x3] }
  0x4c   : > { %3485 = vsyncadd (%p4322_p6), [#allocation6], 4294966656  ;;  %3164 = vmatprep.subr.bf16.mxu0 %v3510_v0  ;;  %3168 = vmatprep.mubr.msk.bf16.mxu0 %vm3511_vm0, %v3510_v0  ;;  %vm454_vm2 = vcmask 31744   ;;  %v469_v4 = vsel %vm467_vm1, %v433_v3, 0  ;;  %v3314_v5 = vld [vmem:[%s4300_s3 + $0x8] sm:$0xff]   ;;  %v3317_v9 = vld [vmem:[%s4300_s3] sm:$0xff]  }
  0x4d   : > { %s338_s9 = scalar_select %p337_p8, %s3578_s28, 1  ;;  %v3689_v2 = vshrl.u32 %v419_v1, 7  ;;  %3244 = vmatprep.subr.msk.bf16.mxu1 %vm467_vm1, %v433_v3  ;;  %3165 = vmatpush3.bf16.msra.mxu0 %v3314_v5  ;;  %vm374_vm3 = vcmask 261120   ;;  %v3726_v12 = vld [vmem:[%s4302_s5] sm:$0xf]  ;;  %vm905_vm4 = vcmask 1041409  }
  0x4e   : > { %3173 = vmatpush3.bf16.msra.mxu1 %v469_v4  ;;  %3166 = vmatprep.subr.bf16.mxu0 %v3510_v0  ;;  %s3512_s19 = smov 32   ;;  %v347_v30 = vld [vmem:[%s3668_s6] sm:$0xf]  ;;  %v3513_v36 = vmov 1966171168   ;;  %s3514_s6 = smov 96  }
  0x4f   : > { %s3128_s30 = sshll.u32 %s338_s9, 5  ;;  %s3080_s15 = sshll.u32 %s338_s9, 2  ;;  %v3709_v8 = vsub.s32 1, %v3689_v2  ;;  %3187 = vmatprep.subr.bf16.mxu1 %v3510_v0  ;;  %v3745_v15 = vsub.s32 0, %v3689_v2  ;;  %v3756_v29 = vsub.s32 2, %v3689_v2  ;;  %v3760_v32 = vunpack.c.l.bf16 %v347_v30 }
  0x50   : > { %s3686_s14 = scalar_lea.vmem %s4299_s2, %s3128_s30  ;;  %s340_s20 = scalar_lea.vmem %s4297_s0, %s3080_s15  ;;  %v539_v37 = vunpack.c.l.s4 %v3513_v36  ;;  %vm907_vm5 = vcmask 1042434   ;;  %vm909_vm6 = vcmask 1043459   ;;  %vm911_vm7 = vcmask 1044484  }
  0x51   : > { %v3700_v6 = vld [vmem:[%s3686_s14] sm:$0xff]   ;;  %v3703_v7 = vld [vmem:[%s3686_s14 + $0x8] sm:$0xff]   ;;  %v3721_v10 = vld [vmem:[%s3686_s14 + $0x10] sm:$0xff]   ;;  %3167 = vmatpush3.bf16.msra.mxu0 %v3317_v9  ;;  %v427_v13 = vrot.slane %v3726_v12, %v3709_v8  ;;  %v422_v18 = vrot.slane %v3726_v12, %v3745_v15  ;;  %v697_v33 = vrot.slane %v3726_v12, %v3756_v29  ;;  %v777_v34 = vrot.slane %v3760_v32, %v3709_v8  ;;  %s2953_s29 = scalar_lea.sflag [#allocation4], %s3664_s18  ;;  %p4323_p11 = scmp.ne.s32.totalorder %s4317_s22, 0 }
  0x52   : > { %3174 = vmatprep.mubr.msk.bf16.mxu1 %vm454_vm2, %v3700_v6  ;;  %v357_v11 = vld [vmem:[%s340_s20] sm:$0xf]  ;;  %3182 = vmatprep.subr.mxu0 %v3510_v0  ;;  %v3734_v14 = vld [vmem:[%s3686_s14 + $0x18] sm:$0xff]   ;;  %v770_v35 = vrot.slane %v3760_v32, %v3745_v15  ;;  %v540_v38 = vunpack.c.0.s8 %v539_v37  ;;  %vm913_vm8 = vcmask 1045509   ;;  %vm915_vm9 = vcmask 1046534   ;;  %s3516_s30 = smov [#allocation7]  }
  0x53   : > { %3175 = vmatmul.mubr.msk.bf16.vlgmr.msra.gmra.mxu1 %vm454_vm2, %v3703_v7  ;;  %429 = vrot.lane.b32.xlu0 %v427_v13, %s3512_s19  ;;  %vm917_vm10 = vcmask 1047559   ;;  %vm920_vm11 = vcmask 64512  }
  0x54   : > { %3178 = vmatprep.mubr.msk.bf16.mxu1 %vm454_vm2, %v3721_v10  ;;  %3169 = vmatmul.mubr.msk.bf16.vlgmr.msra.gmra.mxu0 %vm374_vm3, %v357_v11  ;;  %v3772_v40 = vsub.s32 %v540_v38, %v3689_v2 }
  0x55   : > { %3184 = vmatprep.mubr.msk.f32.mxu0 %vm3511_vm0, %v3510_v0 }
  0x5b   : > { %3179 = vmatmul.mubr.msk.bf16.gmra.mxu1 %vm454_vm2, %v3734_v14 }
  0x5c   : > { %3191 = vmatprep.mubr.msk.bf16.mxu1 %vm3511_vm0, %v3510_v0 }
  0xc5   : > { %v430_v39 = vpop.permute.xlu0 %429 }
 0x113   : > { %v3176_v16 = vpop.f32.mrf.mxu1 }
 0x114   : > { %650 = vrot.lane.b32.xlu0 %v3176_v16, %s3512_s19  ;;  %v412_v20 = vpop.f32.mrf.mxu0 }
 0x115   : > { %v505_v17 = vpop.f32.mrf.mxu1  ;;  %v423_v21 = vadd.f32 %v422_v18, %v412_v20  ;;  %v432_v41 = vadd.f32 %v430_v39, %v412_v20 }
 0x116   : > { %646 = vrot.lane.b32.xlu1 %v505_v17, %s3512_s19  ;;  %v3170_v23 = vpop.f32.mrf.mxu0 }
 0x117   : > { %v3177_v19 = vpop.f32.mrf.mxu1  ;;  %3183 = vmatpush3.msra.mxu0 %v423_v21  ;;  %v544_v42 = vrot.slane %v432_v41, %v3772_v40  ;;  %v537_v43 = vcombine.high %v432_v41, %v432_v41 }
 0x118   : > { %627 = vrot.lane.b32.xlu0 %v423_v21, %s3512_s19  ;;  %v415_v25 = vpop.f32.mrf.mxu0 }
 0x119   : > { %v508_v22 = vpop.f32.mrf.mxu1  ;;  %v552_v44 = vcombine.high %v544_v42, %v544_v42  ;;  %v551_v45 = vrot.slane %v537_v43, %v3772_v40  ;;  %v560_v46 = vrot.slane %v544_v42, %v3772_v40 }
 0x11a   : > { %652 = vrot.lane.b32.xlu1 %v3177_v19, %s3512_s19  ;;  %v3171_v27 = vpop.f32.mrf.mxu0 }
 0x11b   : > { %v3180_v24 = vpop.f32.mrf.mxu1  ;;  %v574_v47 = vrot.slane %v552_v44, %v3772_v40  ;;  %v553_v50 = vcombine.high %v551_v45, %v551_v45  ;;  %v582_v51 = vcombine.high %v560_v46, %v560_v46  ;;  %v567_v53 = vrot.slane %v551_v45, %v3772_v40 }
 0x11c   : > { %658 = vrot.lane.b32.xlu0 %v3180_v24, %s3512_s19  ;;  %v589_v55 = vrot.slane %v560_v46, %v3745_v15 }
 0x11d   : > { %v521_v26 = vpop.f32.mrf.mxu1  ;;  %v584_v52 = vcombine.high %v574_v47, %v574_v47  ;;  %v593_v57 = vrot.slane %v574_v47, %v3745_v15  ;;  %v581_v58 = vrot.slane %v553_v50, %v3772_v40  ;;  %v597_v59 = vrot.slane %v582_v51, %v3745_v15 }
 0x11e   : > { %648 = vrot.lane.b32.xlu1 %v508_v22, %s3512_s19  ;;  %v583_v62 = vcombine.high %v567_v53, %v567_v53  ;;  %v605_v25 = vrot.slane %v567_v53, %v3745_v15 }
 0x11f   : > { %v3181_v28 = vpop.f32.mrf.mxu1  ;;  %v601_v60 = vrot.slane %v584_v52, %v3745_v15  ;;  %v585_v13 = vcombine.high %v581_v58, %v581_v58  ;;  %v609_v24 = vrot.slane %v581_v58, %v3745_v15 }
 0x120   : > { %654 = vrot.lane.b32.xlu0 %v521_v26, %s3512_s19  ;;  %v613_v17 = vrot.slane %v583_v62, %v3745_v15 }
 0x121   : > { %v524_v31 = vpop.f32.mrf.mxu1  ;;  %v617_v27 = vrot.slane %v585_v13, %v3745_v15 }
 0x122   : > { %656 = vrot.lane.b32.xlu1 %v524_v31, %s3512_s19 }
 0x124   : > { %699 = vrot.lane.b32.xlu0 %v697_v33, %s3512_s19 }
 0x126   : > { %660 = vrot.lane.b32.xlu1 %v3181_v28, %s3512_s19 }
 0x128   : > { %772 = vbcast.lane.b32.xlu0 %v770_v35, 256 }
 0x12a   : > { %779 = vbcast.lane.b32.xlu1 %v777_v34, 256 }
 0x186   : > { %v651_v48 = vpop.permute.xlu0 %650 }
 0x188   : > { %v647_v49 = vpop.permute.xlu1 %646 }
 0x18a   : > { %v628_v56 = vpop.permute.xlu0 %627 }
 0x18b   : > { %v631_v61 = vadd.f32 %v628_v56, %v593_v57  ;;  %v630_v63 = vadd.f32 %v628_v56, %v589_v55  ;;  %v632_v4 = vadd.f32 %v628_v56, %v597_v59  ;;  %v633_v5 = vadd.f32 %v628_v56, %v601_v60 }
 0x18c   : > { %v653_v54 = vpop.permute.xlu1 %652  ;;  %v636_v23 = vadd.f32 %v628_v56, %v613_v17  ;;  %v635_v30 = vadd.f32 %v628_v56, %v609_v24  ;;  %v634_v31 = vadd.f32 %v628_v56, %v605_v25  ;;  %v637_v33 = vadd.f32 %v628_v56, %v617_v27 }
 0x18d   : > { %v670_v16 = vadd.f32 %v647_v49, %v630_v63  ;;  %v672_v21 = vadd.f32 %v651_v48, %v632_v4  ;;  %v673_v22 = vadd.f32 %v653_v54, %v633_v5  ;;  %v3795_v60 = vsub.s32 3, %v3689_v2 }
 0x18e   : > { %v659_v11 = vpop.permute.xlu0 %658  ;;  %v784_v63 = vrot.slane %v3760_v32, %v3756_v29  ;;  %v3807_v5 = vsub.s32 5, %v3689_v2 }
 0x18f   : > { %v678_v20 = vmul.f32 0.2, %v670_v16  ;;  %v676_v28 = vadd.f32 %v659_v11, %v636_v23  ;;  %v680_v37 = vmul.f32 0.2, %v672_v21  ;;  %v681_v38 = vmul.f32 0.2, %v673_v22 }
 0x190   : > { %v649_v3 = vpop.permute.xlu1 %648  ;;  %v791_v4 = vrot.slane %v3760_v32, %v3795_v60  ;;  %v805_v11 = vrot.slane %v3760_v32, %v3807_v5 }
 0x191   : > { %v671_v9 = vadd.f32 %v649_v3, %v631_v61  ;;  %v686_v36 = vmax.f32 %v670_v16, %v678_v20  ;;  %v684_v47 = vmul.f32 0.2, %v676_v28  ;;  %v688_v48 = vmax.f32 %v672_v21, %v680_v37 }
 0x192   : > { %v655_v26 = vpop.permute.xlu0 %654  ;;  %v689_v49 = vmax.f32 %v673_v22, %v681_v38  ;;  %v3802_v3 = vsub.s32 4, %v3689_v2  ;;  %v3831_v38 = vsub.s32 7, %v3689_v2 }
 0x193   : > { %v679_v18 = vmul.f32 0.2, %v671_v9  ;;  %v674_v43 = vadd.f32 %v655_v26, %v634_v31  ;;  %v692_v55 = vmax.f32 %v676_v28, %v684_v47 }
 0x194   : > { %v657_v19 = vpop.permute.xlu1 %656 }
 0x195   : > { %v687_v34 = vmax.f32 %v671_v9, %v679_v18  ;;  %v675_v39 = vadd.f32 %v657_v19, %v635_v30  ;;  %v682_v51 = vmul.f32 0.2, %v674_v43  ;;  %v798_v9 = vrot.slane %v3760_v32, %v3802_v3 }
 0x196   : > { %v700_v42 = vpop.permute.xlu0 %699 }
 0x197   : > { %v702_v44 = vmul.f32 %v700_v42, %v686_v36  ;;  %v703_v45 = vmul.f32 %v700_v42, %v687_v34  ;;  %v683_v50 = vmul.f32 0.2, %v675_v39  ;;  %v704_v53 = vmul.f32 %v700_v42, %v688_v48 }
 0x198   : > { %v661_v35 = vpop.permute.xlu1 %660  ;;  %v705_v54 = vmul.f32 %v700_v42, %v689_v49  ;;  %v690_v57 = vmax.f32 %v674_v43, %v682_v51  ;;  %v708_v58 = vmul.f32 %v700_v42, %v692_v55  ;;  %v3826_v36 = vsub.s32 6, %v3689_v2 }
 0x199   : > { %v677_v41 = vadd.f32 %v661_v35, %v637_v33  ;;  %718 = vrot.lane.b32.xlu1 %v702_v44, %s3514_s6  ;;  %720 = vrot.lane.b32.xlu0 %v703_v45, %s3514_s6  ;;  %v691_v56 = vmax.f32 %v675_v39, %v683_v50  ;;  %v3515_v35 = vmov 0   ;;  %v819_v39 = vrot.slane %v3760_v32, %v3831_v38 }
 0x19a   : > { %v706_v61 = vmul.f32 %v700_v42, %v690_v57  ;;  %v3815_v16 = vpop.permute.xlu0 %772  ;;  %3313 = vset.pattern.permute.xlu0 %v3515_v35  ;;  %3312 = vset.pattern.permute.xlu1 %v3515_v35  ;;  %v812_v37 = vrot.slane %v3760_v32, %v3826_v36 }
 0x19b   : > { %v685_v46 = vmul.f32 0.2, %v677_v41  ;;  %v707_v62 = vmul.f32 %v700_v42, %v691_v56 }
 0x19c   : > { %v3813_v13 = vpop.permute.xlu1 %779 }
 0x19d   : > { %v693_v52 = vmax.f32 %v677_v41, %v685_v46  ;;  %722 = vrot.lane.b32.xlu1 %v704_v53, %s3514_s6  ;;  %724 = vrot.lane.b32.xlu0 %v705_v54, %s3514_s6 }
 0x19f   : > { %v709_v59 = vmul.f32 %v700_v42, %v693_v52 }
 0x1a1   : > { %730 = vrot.lane.b32.xlu1 %v708_v58, %s3514_s6  ;;  %732 = vrot.lane.b32.xlu0 %v709_v59, %s3514_s6 }
 0x1a5   : > { %726 = vrot.lane.b32.xlu1 %v706_v61, %s3514_s6  ;;  %728 = vrot.lane.b32.xlu0 %v707_v62, %s3514_s6 }
 0x1a9   : > { %786 = vbcast.lane.b32.xlu1 %v784_v63, 256  ;;  %793 = vbcast.lane.b32.xlu0 %v791_v4, 256  ;;  %v872_v63 = vand.u32 127, %v419_v1 }
 0x1ad   : > { %800 = vbcast.lane.b32.xlu1 %v798_v9, 256  ;;  %807 = vbcast.lane.b32.xlu0 %v805_v11, 256  ;;  %v3872_v9 = vsub.s32 %v872_v63, %v3689_v2 }
 0x20b   : > { %v719_v17 = vpop.permute.xlu1 %718  ;;  %v721_v18 = vpop.permute.xlu0 %720 }
 0x20c   : > { %v742_v19 = vsel %vm374_vm3, %v719_v17, 0.0  ;;  %v745_v20 = vsel %vm374_vm3, %v721_v18, 0.0 }
 0x20d   : > { %743 = vadd.xlane.f32.xlu1 %v742_v19  ;;  %746 = vadd.xlane.f32.xlu0 %v745_v20 }
 0x20f   : > { %v723_v21 = vpop.permute.xlu1 %722  ;;  %v725_v22 = vpop.permute.xlu0 %724 }
 0x210   : > { %v748_v23 = vsel %vm374_vm3, %v723_v21, 0.0  ;;  %v751_v24 = vsel %vm374_vm3, %v725_v22, 0.0 }
 0x211   : > { %749 = vadd.xlane.f32.xlu0 %v748_v23  ;;  %752 = vadd.xlane.f32.xlu1 %v751_v24 }
 0x213   : > { %v731_v25 = vpop.permute.xlu1 %730  ;;  %v733_v26 = vpop.permute.xlu0 %732 }
 0x214   : > { %v760_v27 = vsel %vm374_vm3, %v731_v25, 0.0  ;;  %v763_v28 = vsel %vm374_vm3, %v733_v26, 0.0 }
 0x215   : > { %761 = vadd.xlane.f32.xlu0 %v760_v27  ;;  %764 = vadd.xlane.f32.xlu1 %v763_v28 }
 0x217   : > { %v727_v30 = vpop.permute.xlu1 %726  ;;  %v729_v31 = vpop.permute.xlu0 %728 }
 0x218   : > { %v754_v33 = vsel %vm374_vm3, %v727_v30, 0.0  ;;  %v757_v34 = vsel %vm374_vm3, %v729_v31, 0.0 }
 0x219   : > { %755 = vadd.xlane.f32.xlu0 %v754_v33  ;;  %758 = vadd.xlane.f32.xlu1 %v757_v34 }
 0x21b   : > { %v3835_v41 = vpop.permute.xlu1 %786  ;;  %v3837_v42 = vpop.permute.xlu0 %793 }
 0x21f   : > { %v3839_v43 = vpop.permute.xlu1 %800  ;;  %v3841_v44 = vpop.permute.xlu0 %807 }
 0x22a   : > { %814 = vbcast.lane.b32.xlu1 %v812_v37, 256 }
 0x22f   : > { %821 = vbcast.lane.b32.xlu0 %v819_v39, 256 }
 0x296   : > { %v744_v45 = vpop.xlane.xlu1 %743  ;;  %v747_v46 = vpop.xlane.xlu0 %746 }
 0x297   : > { %v3844_v47 = vadd.f32 %v3815_v16, %v744_v45  ;;  %v3847_v48 = vadd.f32 %v3813_v13, %v747_v46 }
 0x299   : > { %848 = vperm.xlu1 %3312, %v3844_v47   ;;  %851 = vperm.xlu0 %3313, %v3847_v48  }
 0x29a   : > { %v753_v32 = vpop.xlane.xlu1 %752  ;;  %v750_v49 = vpop.xlane.xlu0 %749 }
 0x29b   : > { %v833_v50 = vadd.f32 %v3835_v41, %v750_v49  ;;  %v834_v53 = vadd.f32 %v3837_v42, %v753_v32 }
 0x29d   : > { %854 = vperm.xlu1 %3312, %v833_v50  }
 0x29e   : > { %v765_v51 = vpop.xlane.xlu1 %764  ;;  %v762_v52 = vpop.xlane.xlu0 %761 }
 0x2a1   : > { %857 = vperm.xlu1 %3312, %v834_v53  }
 0x2a2   : > { %v759_v54 = vpop.xlane.xlu1 %758  ;;  %v756_v55 = vpop.xlane.xlu0 %755 }
 0x2a3   : > { %v3854_v56 = vadd.f32 %v3841_v44, %v759_v54  ;;  %v835_v57 = vadd.f32 %v3839_v43, %v756_v55 }
 0x2a5   : > { %863 = vperm.xlu1 %3312, %v3854_v56   ;;  %860 = vperm.xlu0 %3313, %v835_v57  }
 0x2a6   : > { %v3858_v58 = vpop.permute.xlu1 %814  ;;  %v3860_v59 = vpop.permute.xlu0 %821 }
 0x2a7   : > { %v3863_v61 = vadd.f32 %v3858_v58, %v762_v52  ;;  %v3866_v62 = vadd.f32 %v3860_v59, %v765_v51 }
 0x2a9   : > { %866 = vperm.xlu0 %3313, %v3863_v61   ;;  %869 = vperm.xlu1 %3312, %v3866_v62  }
 0x314   : > { %v849_v4 = vpop.permute.xlu1 %848  ;;  %v852_v17 = vpop.permute.xlu0 %851 }
 0x315   : > { %v876_v18 = vrot.slane %v849_v4, %v3872_v9  ;;  %v880_v19 = vrot.slane %v852_v17, %v3872_v9 }
 0x317   : > { %v906_v1 = vsel %vm905_vm4, %v880_v19, %v876_v18 }
 0x318   : > { %v855_v11 = vpop.permute.xlu1 %854 }
 0x319   : > { %v884_v21 = vrot.slane %v855_v11, %v3872_v9 }
 0x31b   : > { %v908_v24 = vsel %vm907_vm5, %v884_v21, %v906_v1 }
 0x31c   : > { %v858_v20 = vpop.permute.xlu1 %857 }
 0x31d   : > { %v888_v22 = vrot.slane %v858_v20, %v3872_v9 }
 0x31f   : > { %v910_v26 = vsel %vm909_vm6, %v888_v22, %v908_v24 }
 0x320   : > { %v864_v23 = vpop.permute.xlu1 %863  ;;  %v861_v2 = vpop.permute.xlu0 %860 }
 0x321   : > { %v892_v25 = vrot.slane %v861_v2, %v3872_v9  ;;  %v896_v27 = vrot.slane %v864_v23, %v3872_v9 }
 0x323   : > { %v912_v28 = vsel %vm911_vm7, %v892_v25, %v910_v26 }
 0x324   : > { %v870_v30 = vpop.permute.xlu1 %869  ;;  %v867_v31 = vpop.permute.xlu0 %866  ;;  %v914_v35 = vsel %vm913_vm8, %v896_v27, %v912_v28 }
 0x325   : > { %v904_v33 = vrot.slane %v870_v30, %v3872_v9  ;;  %v900_v34 = vrot.slane %v867_v31, %v3872_v9 }
 0x327   : > { %v916_v37 = vsel %vm915_vm9, %v900_v34, %v914_v35 }
 0x328   : > { %v918_v39 = vsel %vm917_vm10, %v904_v33, %v916_v37 }
 0x329   : > { %v921_v45 = vsel %vm920_vm11, %v918_v39, -inf }
 0x32a   : > { %922 = vmax.xlane.f32.xlu0 %v921_v45 }
 0x3b3   : > { %v923_v46 = vpop.xlane.xlu0 %922 }
 0x3b4   : > { %v928_v32 = vrot.slane %v923_v46, %v3745_v15  ;;  %v932_v49 = vrot.slane %v923_v46, %v3709_v8  ;;  %v936_v51 = vrot.slane %v923_v46, %v3756_v29  ;;  %v940_v63 = vrot.slane %v923_v46, %v3795_v60 }
 0x3b5   : > { %v944_v17 = vrot.slane %v923_v46, %v3802_v3  ;;  %v948_v20 = vrot.slane %v923_v46, %v3807_v5 }
 0x3b6   : > { %v965_v52 = vsub.f32 %v3844_v47, %v928_v32  ;;  %v966_v54 = vsub.f32 %v3847_v48, %v932_v49  ;;  %v967_v4 = vsub.f32 %v833_v50, %v936_v51  ;;  %v968_v18 = vsub.f32 %v834_v53, %v940_v63 }
 0x3b7   : > { %v969_v21 = vsub.f32 %v835_v57, %v944_v17  ;;  %v952_v47 = vrot.slane %v923_v46, %v3826_v36  ;;  %v970_v48 = vsub.f32 %v3854_v56, %v948_v20  ;;  %v956_v50 = vrot.slane %v923_v46, %v3831_v38 }
 0x3b8   : > { %v973_v55 = vmul.f32 1.442695, %v965_v52  ;;  %v975_v11 = vmul.f32 1.442695, %v966_v54  ;;  %v977_v19 = vmul.f32 1.442695, %v967_v4 }
 0x3b9   : > { %v979_v22 = vmul.f32 1.442695, %v968_v18  ;;  %v981_v1 = vmul.f32 1.442695, %v969_v21  ;;  %v971_v2 = vsub.f32 %v3863_v61, %v952_v47  ;;  %v983_v53 = vmul.f32 1.442695, %v970_v48 }
 0x3ba   : > { %3324 = vpow2.f32 %v973_v55  ;;  %v972_v57 = vsub.f32 %v3866_v62, %v956_v50 }
 0x3bb   : > { %3326 = vpow2.f32 %v975_v11  ;;  %v985_v25 = vmul.f32 1.442695, %v971_v2 }
 0x3bc   : > { %3328 = vpow2.f32 %v977_v19  ;;  %v987_v56 = vmul.f32 1.442695, %v972_v57 }
 0x3bd   : > { %3330 = vpow2.f32 %v979_v22 }
 0x3be   : > { %3332 = vpow2.f32 %v981_v1 }
 0x3bf   : > { %3334 = vpow2.f32 %v983_v53 }
 0x3c0   : > { %3336 = vpow2.f32 %v985_v25 }
 0x3c1   : > { %3338 = vpow2.f32 %v987_v56 }
 0x3c7   : > { %v3325_v23 = vpop.eup %3324 }
 0x3c8   : > { %998 = vperm.xlu1 %3312, %v3325_v23   ;;  %v3327_v24 = vpop.eup %3326 }
 0x3c9   : > { %v3329_v26 = vpop.eup %3328 }
 0x3ca   : > { %v3331_v27 = vpop.eup %3330 }
 0x3cb   : > { %v3333_v28 = vpop.eup %3332 }
 0x3cc   : > { %1001 = vperm.xlu1 %3312, %v3327_v24   ;;  %v3335_v30 = vpop.eup %3334 }
 0x3cd   : > { %v3337_v61 = vpop.eup %3336 }
 0x3ce   : > { %v3339_v31 = vpop.eup %3338 }
 0x3d0   : > { %1004 = vperm.xlu1 %3312, %v3329_v26  }
 0x3d4   : > { %1007 = vperm.xlu1 %3312, %v3331_v27  }
 0x3d8   : > { %1010 = vperm.xlu1 %3312, %v3333_v28  }
 0x3dc   : > { %1013 = vperm.xlu1 %3312, %v3335_v30  }
 0x3e0   : > { %1016 = vperm.xlu1 %3312, %v3337_v61  }
 0x3e4   : > { %1019 = vperm.xlu1 %3312, %v3339_v31  }
 0x443   : > { %v999_v33 = vpop.permute.xlu1 %998 }
 0x444   : > { %v1024_v32 = vrot.slane %v999_v33, %v3872_v9 }
 0x447   : > { %v1002_v34 = vpop.permute.xlu1 %1001 }
 0x448   : > { %v1028_v45 = vrot.slane %v1002_v34, %v3872_v9 }
 0x44a   : > { %v1053_v54 = vsel %vm905_vm4, %v1028_v45, %v1024_v32 }
 0x44b   : > { %v1005_v62 = vpop.permute.xlu1 %1004 }
 0x44c   : > { %v1032_v46 = vrot.slane %v1005_v62, %v3872_v9 }
 0x44e   : > { %v1054_v63 = vsel %vm907_vm5, %v1032_v46, %v1053_v54 }
 0x44f   : > { %v1008_v35 = vpop.permute.xlu1 %1007 }
 0x450   : > { %v1036_v49 = vrot.slane %v1008_v35, %v3872_v9 }
 0x452   : > { %v1055_v11 = vsel %vm909_vm6, %v1036_v49, %v1054_v63 }
 0x453   : > { %v1011_v37 = vpop.permute.xlu1 %1010 }
 0x454   : > { %v1040_v51 = vrot.slane %v1011_v37, %v3872_v9 }
 0x456   : > { %v1056_v17 = vsel %vm911_vm7, %v1040_v51, %v1055_v11 }
 0x457   : > { %v1014_v39 = vpop.permute.xlu1 %1013 }
 0x458   : > { %v1044_v55 = vrot.slane %v1014_v39, %v3872_v9 }
 0x45a   : > { %v1057_v20 = vsel %vm913_vm8, %v1044_v55, %v1056_v17 }
 0x45b   : > { %v1017_v52 = vpop.permute.xlu1 %1016 }
 0x45c   : > { %v1048_v4 = vrot.slane %v1017_v52, %v3872_v9 }
 0x45e   : > { %v1058_v21 = vsel %vm915_vm9, %v1048_v4, %v1057_v20 }
 0x45f   : > { %v1020_v18 = vpop.permute.xlu1 %1019 }
 0x460   : > { %v1052_v19 = vrot.slane %v1020_v18, %v3872_v9 }
 0x462   : > { %v1059_v22 = vsel %vm917_vm10, %v1052_v19, %v1058_v21 }
 0x463   : > { %v1061_v47 = vsel %vm920_vm11, %v1059_v22, 0.0 }
 0x464   : > { %1062 = vadd.xlane.f32.xlu0 %v1061_v47 }
 0x4ed   : > { %v1063_v48 = vpop.xlane.xlu0 %1062 }
 0x4ee   : > { %3340 = vrcp.f32 %v1063_v48 }
 0x4fb   : > { %v3341_v1 = vpop.eup %3340 }
 0x4fc   : > { %v1073_v50 = vrot.slane %v3341_v1, %v3709_v8  ;;  %v1069_v2 = vrot.slane %v3341_v1, %v3745_v15  ;;  %v1077_v25 = vrot.slane %v3341_v1, %v3756_v29  ;;  %v1081_v33 = vrot.slane %v3341_v1, %v3795_v60 }
 0x4fd   : > { %v1085_v62 = vrot.slane %v3341_v1, %v3802_v3  ;;  %v1089_v37 = vrot.slane %v3341_v1, %v3807_v5  ;;  %v1097_v45 = vrot.slane %v3341_v1, %v3831_v38 }
 0x4fe   : > { %v1107_v53 = vmul.f32 %v3327_v24, %v1073_v50  ;;  %v1106_v57 = vmul.f32 %v3325_v23, %v1069_v2  ;;  %v1108_v56 = vmul.f32 %v3329_v26, %v1077_v25  ;;  %v1109_v34 = vmul.f32 %v3331_v27, %v1081_v33  ;;  %v3103_v27 = vld [vmem:[%s4301_s4 + $0x2] sm:$0x3] }
 0x4ff   : > { %v1110_v35 = vmul.f32 %v3333_v28, %v1085_v62  ;;  %v1111_v39 = vmul.f32 %v3335_v30, %v1089_v37  ;;  %v1093_v24 = vrot.slane %v3341_v1, %v3826_v36  ;;  %v1113_v26 = vmul.f32 %v3339_v31, %v1097_v45  ;;  %3245 = vmatprep.subr.msk.bf16.mxu0 %vm467_vm1, %v3103_v27  ;;  %v3320_v28 = vld [vmem:[%s4300_s3 + $0x18] sm:$0xff]   ;;  %v3321_v30 = vld [vmem:[%s4300_s3 + $0x10] sm:$0xff]  }
 0x500   : > { %1130 = vperm.xlu0 %3313, %v1107_v53   ;;  %1127 = vperm.xlu1 %3312, %v1106_v57   ;;  %v1342_v2 = vsel %vm467_vm1, %v3103_v27, 0  ;;  %v3970_v57 = vld [vmem:[%s4302_s5 + $0x4] sm:$0xf] }
 0x501   : > { %v1112_v23 = vmul.f32 %v3337_v61, %v1093_v24  ;;  %3188 = vmatpush3.bf16.msra.mxu1 %v3320_v28  ;;  %v1570_v24 = vrot.slane %v3970_v57, %v3756_v29 }
 0x502   : > { %3189 = vmatprep.subr.bf16.mxu1 %v3510_v0 }
 0x504   : > { %1133 = vperm.xlu1 %3312, %v1108_v56  }
 0x505   : > { %3190 = vmatpush3.bf16.msra.mxu1 %v3321_v30 }
 0x506   : > { %3205 = vmatprep.subr.mxu1 %v3510_v0 }
 0x508   : > { %1136 = vperm.xlu1 %3312, %v1109_v34  }
 0x50c   : > { %1139 = vperm.xlu1 %3312, %v1110_v35  }
 0x510   : > { %1142 = vperm.xlu1 %3312, %v1111_v39  }
 0x514   : > { %1145 = vperm.xlu1 %3312, %v1112_v23   ;;  %v1328_v23 = vrot.slane %v3970_v57, %v3745_v15 }
 0x518   : > { %1148 = vperm.xlu1 %3312, %v1113_v26  }
 0x57b   : > { %v1128_v61 = vpop.permute.xlu1 %1127  ;;  %v1131_v49 = vpop.permute.xlu0 %1130 }
 0x57c   : > { %v1157_v52 = vrot.slane %v1131_v49, %v3872_v9  ;;  %v1153_v54 = vrot.slane %v1128_v61, %v3872_v9 }
 0x57e   : > { %v1182_v17 = vsel %vm905_vm4, %v1157_v52, %v1153_v54 }
 0x57f   : > { %v1134_v31 = vpop.permute.xlu1 %1133 }
 0x580   : > { %v1161_v55 = vrot.slane %v1134_v31, %v3872_v9 }
 0x582   : > { %v1183_v19 = vsel %vm907_vm5, %v1161_v55, %v1182_v17 }
 0x583   : > { %v1137_v46 = vpop.permute.xlu1 %1136 }
 0x584   : > { %v1165_v63 = vrot.slane %v1137_v46, %v3872_v9 }
 0x586   : > { %v1184_v21 = vsel %vm909_vm6, %v1165_v63, %v1183_v19 }
 0x587   : > { %v1140_v32 = vpop.permute.xlu1 %1139 }
 0x588   : > { %v1169_v4 = vrot.slane %v1140_v32, %v3872_v9 }
 0x58a   : > { %v1185_v22 = vsel %vm911_vm7, %v1169_v4, %v1184_v21 }
 0x58b   : > { %v1143_v51 = vpop.permute.xlu1 %1142 }
 0x58c   : > { %v1173_v18 = vrot.slane %v1143_v51, %v3872_v9 }
 0x58e   : > { %v1186_v48 = vsel %vm913_vm8, %v1173_v18, %v1185_v22 }
 0x58f   : > { %v1146_v11 = vpop.permute.xlu1 %1145 }
 0x590   : > { %v1177_v20 = vrot.slane %v1146_v11, %v3872_v9 }
 0x592   : > { %v1187_v50 = vsel %vm915_vm9, %v1177_v20, %v1186_v48 }
 0x593   : > { %v1149_v47 = vpop.permute.xlu1 %1148 }
 0x594   : > { %v1181_v1 = vrot.slane %v1149_v47, %v3872_v9 }
 0x596   : > { %v1188_v53 = vsel %vm917_vm10, %v1181_v1, %v1187_v50 }
 0x597   : > { %3185 = vmatmul.mubr.msk.f32.vlgmr.msra.gmra.mxu0 %vm920_vm11, %v1188_v53 }
 0x598   : > { %3196 = vmatpush3.bf16.msra.mxu0 %v1342_v2  ;;  %3197 = vmatprep.mubr.msk.bf16.mxu0 %vm454_vm2, %v3700_v6  ;;  %v1333_v6 = vrot.slane %v3970_v57, %v3709_v8 }
 0x599   : > { %3210 = vmatprep.subr.bf16.mxu0 %v3510_v0 }
 0x59a   : > { %1335 = vrot.lane.b32.xlu0 %v1333_v6, %s3512_s19 }
 0x59b   : > { %3198 = vmatmul.mubr.msk.bf16.vlgmr.msra.gmra.mxu0 %vm454_vm2, %v3703_v7  ;;  %v1117_v7 = vrot.slane %v3726_v12, %v3795_v60 }
 0x59c   : > { %3201 = vmatprep.mubr.msk.bf16.mxu0 %vm454_vm2, %v3721_v10 }
 0x5a3   : > { %3202 = vmatmul.mubr.msk.bf16.gmra.mxu0 %vm454_vm2, %v3734_v14 }
 0x5a4   : > { %3214 = vmatprep.mubr.msk.bf16.mxu0 %vm3511_vm0, %v3510_v0 }
 0x60c   : > { %v1336_v46 = vpop.permute.xlu0 %1335 }
 0x657   : > { %v1257_v10 = vpop.f32.mrf.mxu0 }
 0x658   : > { %v1258_v25 = vadd.f32 %v1257_v10, %v1117_v7 }
 0x659   : > { %v3186_v56 = vpop.f32.mrf.mxu0 }
 0x65a   : > { %v1261_v14 = vmax.f32 %v1258_v25, 0.0 }
 0x65b   : > { %v3199_v33 = vpop.f32.mrf.mxu0 }
 0x65c   : > { %v1262_v34 = vpack.c.bf16 %v1261_v14, %v1261_v14  ;;  %1523 = vrot.lane.b32.xlu0 %v3199_v33, %s3512_s19 }
 0x65d   : > { %v1378_v62 = vpop.f32.mrf.mxu0 }
 0x65e   : > { %3192 = vmatmul.mubr.msk.bf16.vlgmr.msra.gmra.mxu1 %vm374_vm3, %v1262_v34 }
 0x65f   : > { %v3200_v35 = vpop.f32.mrf.mxu0  ;;  %3207 = vmatprep.mubr.msk.f32.mxu1 %vm3511_vm0, %v3510_v0 }
 0x660   : > { %1525 = vrot.lane.b32.xlu1 %v3200_v35, %s3512_s19  ;;  %1519 = vrot.lane.b32.xlu0 %v1378_v62, %s3512_s19 }
 0x661   : > { %v1381_v12 = vpop.f32.mrf.mxu0 }
 0x663   : > { %v3203_v37 = vpop.f32.mrf.mxu0 }
 0x664   : > { %1521 = vrot.lane.b32.xlu1 %v1381_v12, %s3512_s19 }
 0x665   : > { %v1394_v39 = vpop.f32.mrf.mxu0 }
 0x666   : > { %1527 = vrot.lane.b32.xlu0 %v1394_v39, %s3512_s19 }
 0x667   : > { %v3204_v27 = vpop.f32.mrf.mxu0 }
 0x669   : > { %v1397_v61 = vpop.f32.mrf.mxu0 }
 0x66a   : > { %1531 = vrot.lane.b32.xlu0 %v3203_v37, %s3512_s19 }
 0x66e   : > { %1572 = vrot.lane.b32.xlu0 %v1570_v24, %s3512_s19 }
 0x6ce   : > { %v1524_v52 = vpop.permute.xlu0 %1523 }
 0x6d2   : > { %v1526_v63 = vpop.permute.xlu1 %1525  ;;  %v1520_v17 = vpop.permute.xlu0 %1519 }
 0x6d6   : > { %v1522_v22 = vpop.permute.xlu1 %1521 }
 0x6d8   : > { %v1528_v47 = vpop.permute.xlu0 %1527 }
 0x6dc   : > { %v1532_v62 = vpop.permute.xlu0 %1531 }
 0x71e   : > { %v1317_v45 = vpop.f32.mrf.mxu1 }
 0x71f   : > { %v1329_v26 = vadd.f32 %v1328_v23, %v1317_v45  ;;  %v1338_v32 = vadd.f32 %v1336_v46, %v1317_v45 }
 0x720   : > { %v3193_v28 = vpop.f32.mrf.mxu1 }
 0x721   : > { %3206 = vmatpush3.msra.mxu1 %v1329_v26  ;;  %1500 = vrot.lane.b32.xlu1 %v1329_v26, %s3512_s19  ;;  %v1417_v49 = vrot.slane %v1338_v32, %v3772_v40  ;;  %v1410_v51 = vcombine.high %v1338_v32, %v1338_v32 }
 0x722   : > { %v1320_v30 = vpop.f32.mrf.mxu1 }
 0x723   : > { %v1425_v54 = vcombine.high %v1417_v49, %v1417_v49  ;;  %v1424_v55 = vrot.slane %v1410_v51, %v3772_v40  ;;  %v1433_v4 = vrot.slane %v1417_v49, %v3772_v40  ;;  %v1573_v49 = vpop.permute.xlu0 %1572 }
 0x724   : > { %v3194_v31 = vpop.f32.mrf.mxu1 }
 0x725   : > { %1529 = vrot.lane.b32.xlu1 %v1397_v61, %s3512_s19  ;;  %v1447_v11 = vrot.slane %v1425_v54, %v3772_v40  ;;  %v1426_v18 = vcombine.high %v1424_v55, %v1424_v55  ;;  %v1440_v19 = vrot.slane %v1424_v55, %v3772_v40  ;;  %v1455_v20 = vcombine.high %v1433_v4, %v1433_v4 }
 0x726   : > { %v1462_v50 = vrot.slane %v1433_v4, %v3745_v15 }
 0x727   : > { %v1457_v21 = vcombine.high %v1447_v11, %v1447_v11  ;;  %v1454_v48 = vrot.slane %v1426_v18, %v3772_v40  ;;  %v1456_v1 = vcombine.high %v1440_v19, %v1440_v19  ;;  %v1466_v2 = vrot.slane %v1447_v11, %v3745_v15 }
 0x728   : > { %v1470_v53 = vrot.slane %v1455_v20, %v3745_v15  ;;  %v1478_v7 = vrot.slane %v1440_v19, %v3745_v15 }
 0x729   : > { %1533 = vrot.lane.b32.xlu1 %v3204_v27, %s3512_s19  ;;  %v1474_v6 = vrot.slane %v1457_v21, %v3745_v15  ;;  %v1482_v25 = vrot.slane %v1454_v48, %v3745_v15  ;;  %v1458_v56 = vcombine.high %v1454_v48, %v1454_v48  ;;  %v1486_v34 = vrot.slane %v1456_v1, %v3745_v15 }
 0x72b   : > { %v1490_v31 = vrot.slane %v1458_v56, %v3745_v15 }
 0x793   : > { %v1501_v10 = vpop.permute.xlu1 %1500 }
 0x794   : > { %v1504_v14 = vadd.f32 %v1501_v10, %v1466_v2  ;;  %v1503_v33 = vadd.f32 %v1501_v10, %v1462_v50  ;;  %v1506_v35 = vadd.f32 %v1501_v10, %v1474_v6  ;;  %v1505_v12 = vadd.f32 %v1501_v10, %v1470_v53 }
 0x795   : > { %v1507_v37 = vadd.f32 %v1501_v10, %v1478_v7  ;;  %v1508_v39 = vadd.f32 %v1501_v10, %v1482_v25  ;;  %v1509_v30 = vadd.f32 %v1501_v10, %v1486_v34  ;;  %v1510_v55 = vadd.f32 %v1501_v10, %v1490_v31 }
 0x796   : > { %v1544_v24 = vadd.f32 %v1522_v22, %v1504_v14  ;;  %v1543_v23 = vadd.f32 %v1520_v17, %v1503_v33  ;;  %v1546_v26 = vadd.f32 %v1526_v63, %v1506_v35  ;;  %v1545_v27 = vadd.f32 %v1524_v52, %v1505_v12 }
 0x797   : > { %v1530_v45 = vpop.permute.xlu1 %1529  ;;  %v1547_v28 = vadd.f32 %v1528_v47, %v1507_v37  ;;  %v1549_v21 = vadd.f32 %v1532_v62, %v1509_v30 }
 0x798   : > { %v1548_v61 = vadd.f32 %v1530_v45, %v1508_v39  ;;  %v1552_v46 = vmul.f32 0.2, %v1544_v24  ;;  %v1551_v32 = vmul.f32 0.2, %v1543_v23  ;;  %v1554_v51 = vmul.f32 0.2, %v1546_v26 }
 0x799   : > { %v1553_v54 = vmul.f32 0.2, %v1545_v27  ;;  %v1555_v17 = vmul.f32 0.2, %v1547_v28  ;;  %v1557_v1 = vmul.f32 0.2, %v1549_v21 }
 0x79a   : > { %v1560_v4 = vmax.f32 %v1544_v24, %v1552_v46  ;;  %v1559_v11 = vmax.f32 %v1543_v23, %v1551_v32  ;;  %v1556_v18 = vmul.f32 0.2, %v1548_v61  ;;  %v1562_v20 = vmax.f32 %v1546_v26, %v1554_v51 }
 0x79b   : > { %v1534_v19 = vpop.permute.xlu1 %1533  ;;  %v1561_v47 = vmax.f32 %v1545_v27, %v1553_v54  ;;  %v1563_v48 = vmax.f32 %v1547_v28, %v1555_v17  ;;  %v1565_v56 = vmax.f32 %v1549_v21, %v1557_v1 }
 0x79c   : > { %v1550_v63 = vadd.f32 %v1534_v19, %v1510_v55  ;;  %v1576_v52 = vmul.f32 %v1573_v49, %v1560_v4  ;;  %v1575_v22 = vmul.f32 %v1573_v49, %v1559_v11  ;;  %v1564_v50 = vmax.f32 %v1548_v61, %v1556_v18 }
 0x79d   : > { %v1578_v53 = vmul.f32 %v1573_v49, %v1562_v20  ;;  %v1577_v6 = vmul.f32 %v1573_v49, %v1561_v47  ;;  %v1579_v10 = vmul.f32 %v1573_v49, %v1563_v48  ;;  %v1581_v14 = vmul.f32 %v1573_v49, %v1565_v56 }
 0x79e   : > { %1593 = vrot.lane.b32.xlu0 %v1576_v52, %s3514_s6  ;;  %1591 = vrot.lane.b32.xlu1 %v1575_v22, %s3514_s6  ;;  %v1558_v2 = vmul.f32 0.2, %v1550_v63  ;;  %v1580_v25 = vmul.f32 %v1573_v49, %v1564_v50 }
 0x7a0   : > { %v1566_v7 = vmax.f32 %v1550_v63, %v1558_v2 }
 0x7a2   : > { %1597 = vrot.lane.b32.xlu0 %v1578_v53, %s3514_s6  ;;  %1595 = vrot.lane.b32.xlu1 %v1577_v6, %s3514_s6  ;;  %v1582_v33 = vmul.f32 %v1573_v49, %v1566_v7 }
 0x7a6   : > { %1599 = vrot.lane.b32.xlu1 %v1579_v10, %s3514_s6  ;;  %1601 = vrot.lane.b32.xlu0 %v1580_v25, %s3514_s6 }
 0x7aa   : > { %1603 = vrot.lane.b32.xlu1 %v1581_v14, %s3514_s6  ;;  %1605 = vrot.lane.b32.xlu0 %v1582_v33, %s3514_s6 }
 0x810   : > { %v1594_v34 = vpop.permute.xlu0 %1593  ;;  %v1592_v62 = vpop.permute.xlu1 %1591 }
 0x811   : > { %v1618_v35 = vsel %vm374_vm3, %v1594_v34, 0.0  ;;  %v1615_v12 = vsel %vm374_vm3, %v1592_v62, 0.0 }
 0x812   : > { %1619 = vadd.xlane.f32.xlu0 %v1618_v35  ;;  %1616 = vadd.xlane.f32.xlu1 %v1615_v12 }
 0x814   : > { %v1598_v37 = vpop.permute.xlu0 %1597  ;;  %v1596_v39 = vpop.permute.xlu1 %1595 }
 0x815   : > { %v1621_v24 = vsel %vm374_vm3, %v1596_v39, 0.0  ;;  %v1624_v26 = vsel %vm374_vm3, %v1598_v37, 0.0 }
 0x816   : > { %1622 = vadd.xlane.f32.xlu0 %v1621_v24 }
 0x818   : > { %v1602_v23 = vpop.permute.xlu0 %1601  ;;  %v1600_v45 = vpop.permute.xlu1 %1599 }
 0x819   : > { %v1627_v27 = vsel %vm374_vm3, %v1600_v45, 0.0  ;;  %v1630_v30 = vsel %vm374_vm3, %v1602_v23, 0.0 }
 0x81a   : > { %1625 = vadd.xlane.f32.xlu0 %v1624_v26  ;;  %1628 = vadd.xlane.f32.xlu1 %v1627_v27 }
 0x81c   : > { %v1604_v28 = vpop.permute.xlu1 %1603  ;;  %v1606_v31 = vpop.permute.xlu0 %1605 }
 0x81d   : > { %v1633_v61 = vsel %vm374_vm3, %v1604_v28, 0.0  ;;  %v1636_v46 = vsel %vm374_vm3, %v1606_v31, 0.0 }
 0x81e   : > { %1631 = vadd.xlane.f32.xlu0 %v1630_v30  ;;  %1634 = vadd.xlane.f32.xlu1 %v1633_v61 }
 0x822   : > { %1637 = vadd.xlane.f32.xlu0 %v1636_v46 }
 0x89b   : > { %v1620_v32 = vpop.xlane.xlu0 %1619  ;;  %v1617_v49 = vpop.xlane.xlu1 %1616 }
 0x89c   : > { %v1640_v51 = vadd.f32 %v1620_v32, %v3813_v13  ;;  %v1639_v54 = vadd.f32 %v1617_v49, %v3815_v16 }
 0x89e   : > { %1659 = vperm.xlu0 %3313, %v1640_v51   ;;  %1656 = vperm.xlu1 %3312, %v1639_v54  }
 0x89f   : > { %v1623_v55 = vpop.xlane.xlu0 %1622 }
 0x8a0   : > { %v1641_v4 = vadd.f32 %v1623_v55, %v3835_v41 }
 0x8a2   : > { %1662 = vperm.xlu1 %3312, %v1641_v4  }
 0x8a3   : > { %v1626_v11 = vpop.xlane.xlu0 %1625  ;;  %v1629_v18 = vpop.xlane.xlu1 %1628 }
 0x8a4   : > { %v1642_v19 = vadd.f32 %v1626_v11, %v3837_v42  ;;  %v1643_v17 = vadd.f32 %v1629_v18, %v3839_v43 }
 0x8a6   : > { %1665 = vperm.xlu1 %3312, %v1642_v19  }
 0x8a7   : > { %v1632_v20 = vpop.xlane.xlu0 %1631  ;;  %v1635_v63 = vpop.xlane.xlu1 %1634 }
 0x8a8   : > { %v1644_v21 = vadd.f32 %v1632_v20, %v3841_v44  ;;  %v1645_v22 = vadd.f32 %v1635_v63, %v3858_v58 }
 0x8aa   : > { %1671 = vperm.xlu0 %3313, %v1644_v21   ;;  %1668 = vperm.xlu1 %3312, %v1643_v17  }
 0x8ab   : > { %v1638_v52 = vpop.xlane.xlu0 %1637 }
 0x8ac   : > { %v1646_v47 = vadd.f32 %v1638_v52, %v3860_v59 }
 0x8ae   : > { %1677 = vperm.xlu0 %3313, %v1646_v47   ;;  %1674 = vperm.xlu1 %3312, %v1645_v22  }
 0x919   : > { %v1657_v48 = vpop.permute.xlu1 %1656  ;;  %v1660_v50 = vpop.permute.xlu0 %1659 }
 0x91a   : > { %v1686_v2 = vrot.slane %v1660_v50, %v3872_v9  ;;  %v1682_v53 = vrot.slane %v1657_v48, %v3872_v9 }
 0x91c   : > { %v1711_v25 = vsel %vm905_vm4, %v1686_v2, %v1682_v53 }
 0x91d   : > { %v1663_v1 = vpop.permute.xlu1 %1662 }
 0x91e   : > { %v1690_v7 = vrot.slane %v1663_v1, %v3872_v9 }
 0x920   : > { %v1712_v33 = vsel %vm907_vm5, %v1690_v7, %v1711_v25 }
 0x921   : > { %v1666_v6 = vpop.permute.xlu1 %1665 }
 0x922   : > { %v1694_v10 = vrot.slane %v1666_v6, %v3872_v9 }
 0x924   : > { %v1713_v62 = vsel %vm909_vm6, %v1694_v10, %v1712_v33 }
 0x925   : > { %v1672_v56 = vpop.permute.xlu0 %1671  ;;  %v1669_v14 = vpop.permute.xlu1 %1668 }
 0x926   : > { %v1698_v34 = vrot.slane %v1669_v14, %v3872_v9  ;;  %v1702_v35 = vrot.slane %v1672_v56, %v3872_v9 }
 0x928   : > { %v1714_v12 = vsel %vm911_vm7, %v1698_v34, %v1713_v62 }
 0x929   : > { %v1678_v37 = vpop.permute.xlu0 %1677  ;;  %v1675_v39 = vpop.permute.xlu1 %1674  ;;  %v1715_v45 = vsel %vm913_vm8, %v1702_v35, %v1714_v12 }
 0x92a   : > { %v1710_v24 = vrot.slane %v1678_v37, %v3872_v9  ;;  %v1706_v23 = vrot.slane %v1675_v39, %v3872_v9 }
 0x92c   : > { %v1716_v26 = vsel %vm915_vm9, %v1706_v23, %v1715_v45 }
 0x92d   : > { %v1717_v27 = vsel %vm917_vm10, %v1710_v24, %v1716_v26 }
 0x92e   : > { %v1719_v28 = vsel %vm920_vm11, %v1717_v27, -inf }
 0x92f   : > { %1720 = vmax.xlane.f32.xlu1 %v1719_v28 }
 0x9b8   : > { %v1721_v30 = vpop.xlane.xlu1 %1720 }
 0x9b9   : > { %v1726_v61 = vrot.slane %v1721_v30, %v3745_v15  ;;  %v1730_v31 = vrot.slane %v1721_v30, %v3709_v8  ;;  %v1734_v46 = vrot.slane %v1721_v30, %v3756_v29  ;;  %v1738_v11 = vrot.slane %v1721_v30, %v3795_v60 }
 0x9ba   : > { %v1742_v63 = vrot.slane %v1721_v30, %v3802_v3  ;;  %v1746_v1 = vrot.slane %v1721_v30, %v3807_v5  ;;  %v1750_v53 = vrot.slane %v1721_v30, %v3826_v36 }
 0x9bb   : > { %v1763_v32 = vsub.f32 %v1639_v54, %v1726_v61  ;;  %v1764_v49 = vsub.f32 %v1640_v51, %v1730_v31  ;;  %v1765_v18 = vsub.f32 %v1641_v4, %v1734_v46  ;;  %v1766_v52 = vsub.f32 %v1642_v19, %v1738_v11 }
 0x9bc   : > { %v1767_v50 = vsub.f32 %v1643_v17, %v1742_v63  ;;  %v1768_v54 = vsub.f32 %v1644_v21, %v1746_v1  ;;  %v1754_v4 = vrot.slane %v1721_v30, %v3831_v38  ;;  %v1769_v7 = vsub.f32 %v1645_v22, %v1750_v53 }
 0x9bd   : > { %v1771_v55 = vmul.f32 1.442695, %v1763_v32  ;;  %v1773_v20 = vmul.f32 1.442695, %v1764_v49  ;;  %v1775_v48 = vmul.f32 1.442695, %v1765_v18 }
 0x9be   : > { %v1777_v2 = vmul.f32 1.442695, %v1766_v52  ;;  %v1779_v51 = vmul.f32 1.442695, %v1767_v50  ;;  %v1781_v10 = vmul.f32 1.442695, %v1768_v54  ;;  %v1770_v25 = vsub.f32 %v1646_v47, %v1754_v4 }
 0x9bf   : > { %3342 = vpow2.f32 %v1771_v55  ;;  %v1783_v56 = vmul.f32 1.442695, %v1769_v7 }
 0x9c0   : > { %3344 = vpow2.f32 %v1773_v20  ;;  %v1785_v14 = vmul.f32 1.442695, %v1770_v25 }
 0x9c1   : > { %3346 = vpow2.f32 %v1775_v48 }
 0x9c2   : > { %3348 = vpow2.f32 %v1777_v2 }
 0x9c3   : > { %3350 = vpow2.f32 %v1779_v51 }
 0x9c4   : > { %3352 = vpow2.f32 %v1781_v10 }
 0x9c5   : > { %3354 = vpow2.f32 %v1783_v56 }
 0x9c6   : > { %3356 = vpow2.f32 %v1785_v14 }
 0x9cc   : > { %v3343_v6 = vpop.eup %3342 }
 0x9cd   : > { %1796 = vperm.xlu0 %3313, %v3343_v6   ;;  %v3345_v19 = vpop.eup %3344 }
 0x9ce   : > { %v3347_v17 = vpop.eup %3346 }
 0x9cf   : > { %v3349_v33 = vpop.eup %3348 }
 0x9d0   : > { %v3351_v21 = vpop.eup %3350 }
 0x9d1   : > { %1799 = vperm.xlu0 %3313, %v3345_v19   ;;  %v3353_v34 = vpop.eup %3352 }
 0x9d2   : > { %v3355_v62 = vpop.eup %3354 }
 0x9d3   : > { %v3357_v22 = vpop.eup %3356 }
 0x9d5   : > { %1802 = vperm.xlu0 %3313, %v3347_v17  }
 0x9d9   : > { %1805 = vperm.xlu0 %3313, %v3349_v33  }
 0x9dd   : > { %1808 = vperm.xlu0 %3313, %v3351_v21  }
 0x9e1   : > { %1811 = vperm.xlu0 %3313, %v3353_v34  }
 0x9e5   : > { %1814 = vperm.xlu0 %3313, %v3355_v62  }
 0x9e9   : > { %1817 = vperm.xlu0 %3313, %v3357_v22  }
 0xa48   : > { %v1797_v35 = vpop.permute.xlu0 %1796 }
 0xa49   : > { %v1822_v26 = vrot.slane %v1797_v35, %v3872_v9 }
 0xa4c   : > { %v1800_v12 = vpop.permute.xlu0 %1799 }
 0xa4d   : > { %v1826_v23 = vrot.slane %v1800_v12, %v3872_v9 }
 0xa4f   : > { %v1851_v61 = vsel %vm905_vm4, %v1826_v23, %v1822_v26 }
 0xa50   : > { %v1803_v47 = vpop.permute.xlu0 %1802 }
 0xa51   : > { %v1830_v45 = vrot.slane %v1803_v47, %v3872_v9 }
 0xa53   : > { %v1852_v46 = vsel %vm907_vm5, %v1830_v45, %v1851_v61 }
 0xa54   : > { %v1806_v37 = vpop.permute.xlu0 %1805 }
 0xa55   : > { %v1834_v27 = vrot.slane %v1806_v37, %v3872_v9 }
 0xa57   : > { %v1853_v49 = vsel %vm909_vm6, %v1834_v27, %v1852_v46 }
 0xa58   : > { %v1809_v39 = vpop.permute.xlu0 %1808 }
 0xa59   : > { %v1838_v28 = vrot.slane %v1809_v39, %v3872_v9 }
 0xa5b   : > { %v1854_v55 = vsel %vm911_vm7, %v1838_v28, %v1853_v49 }
 0xa5c   : > { %v1812_v24 = vpop.permute.xlu0 %1811 }
 0xa5d   : > { %v1842_v31 = vrot.slane %v1812_v24, %v3872_v9 }
 0xa5f   : > { %v1855_v18 = vsel %vm913_vm8, %v1842_v31, %v1854_v55 }
 0xa60   : > { %v1815_v30 = vpop.permute.xlu0 %1814 }
 0xa61   : > { %v1846_v32 = vrot.slane %v1815_v30, %v3872_v9 }
 0xa63   : > { %v1856_v63 = vsel %vm915_vm9, %v1846_v32, %v1855_v18 }
 0xa64   : > { %v1818_v11 = vpop.permute.xlu0 %1817 }
 0xa65   : > { %v1850_v20 = vrot.slane %v1818_v11, %v3872_v9 }
 0xa67   : > { %v1857_v52 = vsel %vm917_vm10, %v1850_v20, %v1856_v63 }
 0xa68   : > { %v1859_v48 = vsel %vm920_vm11, %v1857_v52, 0.0 }
 0xa69   : > { %1860 = vadd.xlane.f32.xlu0 %v1859_v48 }
 0xaf2   : > { %v1861_v1 = vpop.xlane.xlu0 %1860 }
 0xaf3   : > { %3358 = vrcp.f32 %v1861_v1 }
 0xb00   : > { %v3359_v50 = vpop.eup %3358 }
 0xb01   : > { %v1883_v2 = vrot.slane %v3359_v50, %v3802_v3  ;;  %v1867_v53 = vrot.slane %v3359_v50, %v3745_v15  ;;  %v1871_v4 = vrot.slane %v3359_v50, %v3709_v8  ;;  %v1875_v10 = vrot.slane %v3359_v50, %v3756_v29 }
 0xb02   : > { %v1879_v56 = vrot.slane %v3359_v50, %v3795_v60  ;;  %v1887_v35 = vrot.slane %v3359_v50, %v3807_v5  ;;  %v1895_v47 = vrot.slane %v3359_v50, %v3831_v38 }
 0xb03   : > { %v1908_v54 = vmul.f32 %v3351_v21, %v1883_v2  ;;  %v1904_v51 = vmul.f32 %v3343_v6, %v1867_v53  ;;  %v1905_v7 = vmul.f32 %v3345_v19, %v1871_v4  ;;  %v1906_v25 = vmul.f32 %v3347_v17, %v1875_v10  ;;  %v3117_v17 = vld [vmem:[%s4301_s4 + $0x4] sm:$0x3]  ;;  %v3379_v2 = vld [vmem:[%s3686_s14 + $0x8] sm:$0xff]   ;;  %v3380_v53 = vld [vmem:[%s3686_s14 + $0x10] sm:$0xff]  }
 0xb04   : > { %v1907_v14 = vmul.f32 %v3349_v33, %v1879_v56  ;;  %v1909_v12 = vmul.f32 %v3353_v34, %v1887_v35  ;;  %v1891_v21 = vrot.slane %v3359_v50, %v3826_v36  ;;  %v1911_v19 = vmul.f32 %v3357_v22, %v1895_v47  ;;  %3246 = vmatprep.subr.msk.bf16.mxu1 %vm467_vm1, %v3117_v17  ;;  %v3322_v33 = vld [vmem:[%s4300_s3 + $0x28] sm:$0xff]   ;;  %v3323_v34 = vld [vmem:[%s4300_s3 + $0x20] sm:$0xff]  }
 0xb05   : > { %1937 = vperm.xlu0 %3313, %v1908_v54   ;;  %1925 = vperm.xlu1 %3312, %v1904_v51   ;;  %v2140_v48 = vsel %vm467_vm1, %v3117_v17, 0  ;;  %v3378_v50 = vld [vmem:[%s3686_s14] sm:$0xff]   ;;  %v3381_v54 = vld [vmem:[%s3686_s14 + $0x18] sm:$0xff]   ;;  %v4123_v51 = vld [vmem:[%s4302_s5 + $0x8] sm:$0xf]  ;;  %s3079_s14 = sshll.u32 %s3664_s18, 3 }
 0xb06   : > { %v1910_v6 = vmul.f32 %v3355_v62, %v1891_v21  ;;  %3211 = vmatpush3.bf16.msra.mxu0 %v3322_v33  ;;  %v2131_v4 = vrot.slane %v4123_v51, %v3709_v8 }
 0xb07   : > { %3212 = vmatprep.subr.bf16.mxu0 %v3510_v0 }
 0xb09   : > { %1928 = vperm.xlu1 %3312, %v1905_v7   ;;  %v1915_v7 = vrot.slane %v3970_v57, %v3795_v60 }
 0xb0a   : > { %3213 = vmatpush3.bf16.msra.mxu0 %v3323_v34  ;;  %v2126_v34 = vrot.slane %v4123_v51, %v3745_v15 }
 0xb0b   : > { %3228 = vmatprep.subr.mxu0 %v3510_v0 }
 0xb0d   : > { %1931 = vperm.xlu1 %3312, %v1906_v25  }
 0xb11   : > { %1934 = vperm.xlu1 %3312, %v1907_v14  }
 0xb15   : > { %1940 = vperm.xlu1 %3312, %v1909_v12  }
 0xb19   : > { %1943 = vperm.xlu1 %3312, %v1910_v6  }
 0xb1d   : > { %1946 = vperm.xlu1 %3312, %v1911_v19  }
 0xb21   : > { %2133 = vrot.lane.b32.xlu1 %v2131_v4, %s3512_s19 }
 0xb80   : > { %v1926_v62 = vpop.permute.xlu1 %1925  ;;  %v1938_v28 = vpop.permute.xlu0 %1937 }
 0xb81   : > { %v1951_v26 = vrot.slane %v1926_v62, %v3872_v9  ;;  %v1967_v49 = vrot.slane %v1938_v28, %v3872_v9 }
 0xb84   : > { %v1929_v22 = vpop.permute.xlu1 %1928 }
 0xb85   : > { %v1955_v24 = vrot.slane %v1929_v22, %v3872_v9 }
 0xb87   : > { %v1980_v30 = vsel %vm905_vm4, %v1955_v24, %v1951_v26 }
 0xb88   : > { %v1932_v37 = vpop.permute.xlu1 %1931 }
 0xb89   : > { %v1959_v23 = vrot.slane %v1932_v37, %v3872_v9 }
 0xb8b   : > { %v1981_v61 = vsel %vm907_vm5, %v1959_v23, %v1980_v30  ;;  %v2368_v23 = vrot.slane %v4123_v51, %v3756_v29 }
 0xb8c   : > { %v1935_v39 = vpop.permute.xlu1 %1934 }
 0xb8d   : > { %v1963_v27 = vrot.slane %v1935_v39, %v3872_v9 }
 0xb8f   : > { %v1982_v46 = vsel %vm909_vm6, %v1963_v27, %v1981_v61 }
 0xb90   : > { %v1941_v45 = vpop.permute.xlu1 %1940  ;;  %v1983_v11 = vsel %vm911_vm7, %v1967_v49, %v1982_v46 }
 0xb91   : > { %v1971_v32 = vrot.slane %v1941_v45, %v3872_v9 }
 0xb93   : > { %v1984_v20 = vsel %vm913_vm8, %v1971_v32, %v1983_v11 }
 0xb94   : > { %v1944_v31 = vpop.permute.xlu1 %1943 }
 0xb95   : > { %v1975_v55 = vrot.slane %v1944_v31, %v3872_v9 }
 0xb97   : > { %v1985_v52 = vsel %vm915_vm9, %v1975_v55, %v1984_v20 }
 0xb98   : > { %v1947_v18 = vpop.permute.xlu1 %1946 }
 0xb99   : > { %v1979_v63 = vrot.slane %v1947_v18, %v3872_v9 }
 0xb9b   : > { %v1986_v1 = vsel %vm917_vm10, %v1979_v63, %v1985_v52 }
 0xb9c   : > { %3208 = vmatmul.mubr.msk.f32.vlgmr.msra.gmra.mxu1 %vm920_vm11, %v1986_v1  ;;  %v2134_v45 = vpop.permute.xlu1 %2133 }
 0xb9d   : > { %3219 = vmatpush3.bf16.msra.mxu1 %v2140_v48  ;;  %3220 = vmatprep.mubr.msk.bf16.mxu1 %vm454_vm2, %v3378_v50 }
 0xb9e   : > { %3233 = vmatprep.subr.mxu1 %v3510_v0 }
 0xba0   : > { %3221 = vmatmul.mubr.msk.bf16.vlgmr.msra.gmra.mxu1 %vm454_vm2, %v3379_v2 }
 0xba1   : > { %3224 = vmatprep.mubr.msk.bf16.mxu1 %vm454_vm2, %v3380_v53 }
 0xba8   : > { %3225 = vmatmul.mubr.msk.bf16.gmra.mxu1 %vm454_vm2, %v3381_v54 }
 0xba9   : > { %3241 = vmatprep.mubr.msk.f32.mxu1 %vm3511_vm0, %v3510_v0 }
 0xc5c   : > { %v2055_v10 = vpop.f32.mrf.mxu1 }
 0xc5d   : > { %v2056_v25 = vadd.f32 %v2055_v10, %v1915_v7 }
 0xc5e   : > { %v3209_v56 = vpop.f32.mrf.mxu1 }
 0xc5f   : > { %v2059_v14 = vmax.f32 %v2056_v25, 0.0 }
 0xc60   : > { %v3222_v35 = vpop.f32.mrf.mxu1 }
 0xc61   : > { %v2060_v12 = vpack.c.bf16 %v2059_v14, %v2059_v14  ;;  %2321 = vrot.lane.b32.xlu1 %v3222_v35, %s3512_s19 }
 0xc62   : > { %v2176_v21 = vpop.f32.mrf.mxu1 }
 0xc63   : > { %3215 = vmatmul.mubr.msk.bf16.vlgmr.msra.gmra.mxu0 %vm374_vm3, %v2060_v12 }
 0xc64   : > { %v3223_v6 = vpop.f32.mrf.mxu1  ;;  %3230 = vmatprep.mubr.msk.f32.mxu0 %vm3511_vm0, %v3510_v0 }
 0xc65   : > { %2323 = vrot.lane.b32.xlu0 %v3223_v6, %s3512_s19  ;;  %2317 = vrot.lane.b32.xlu1 %v2176_v21, %s3512_s19 }
 0xc66   : > { %v2179_v57 = vpop.f32.mrf.mxu1 }
 0xc68   : > { %v3226_v47 = vpop.f32.mrf.mxu1 }
 0xc69   : > { %2319 = vrot.lane.b32.xlu0 %v2179_v57, %s3512_s19 }
 0xc6a   : > { %v2192_v19 = vpop.f32.mrf.mxu1 }
 0xc6b   : > { %2325 = vrot.lane.b32.xlu1 %v2192_v19, %s3512_s19 }
 0xc6c   : > { %v3227_v17 = vpop.f32.mrf.mxu1 }
 0xc6e   : > { %v2195_v33 = vpop.f32.mrf.mxu1 }
 0xc6f   : > { %2327 = vrot.lane.b32.xlu0 %v2195_v33, %s3512_s19 }
 0xc73   : > { %2331 = vrot.lane.b32.xlu0 %v3227_v17, %s3512_s19 }
 0xcd3   : > { %v2322_v61 = vpop.permute.xlu1 %2321 }
 0xcd7   : > { %v2324_v46 = vpop.permute.xlu0 %2323  ;;  %v2318_v11 = vpop.permute.xlu1 %2317 }
 0xcdb   : > { %v2320_v52 = vpop.permute.xlu0 %2319 }
 0xcdd   : > { %v2326_v1 = vpop.permute.xlu1 %2325 }
 0xd23   : > { %v2115_v62 = vpop.f32.mrf.mxu0 }
 0xd24   : > { %v2127_v22 = vadd.f32 %v2126_v34, %v2115_v62  ;;  %v2136_v26 = vadd.f32 %v2134_v45, %v2115_v62 }
 0xd25   : > { %v3216_v37 = vpop.f32.mrf.mxu0 }
 0xd26   : > { %3229 = vmatpush3.msra.mxu0 %v2127_v22  ;;  %2298 = vrot.lane.b32.xlu1 %v2127_v22, %s3512_s19  ;;  %v2208_v27 = vcombine.high %v2136_v26, %v2136_v26  ;;  %v2215_v28 = vrot.slane %v2136_v26, %v3772_v40 }
 0xd27   : > { %v2118_v39 = vpop.f32.mrf.mxu0 }
 0xd28   : > { %v2222_v30 = vrot.slane %v2208_v27, %v3772_v40  ;;  %v2223_v31 = vcombine.high %v2215_v28, %v2215_v28  ;;  %v2231_v55 = vrot.slane %v2215_v28, %v3772_v40 }
 0xd29   : > { %v3217_v24 = vpop.f32.mrf.mxu0 }
 0xd2a   : > { %2329 = vrot.lane.b32.xlu1 %v3226_v47, %s3512_s19  ;;  %v2224_v32 = vcombine.high %v2222_v30, %v2222_v30  ;;  %v2245_v49 = vrot.slane %v2223_v31, %v3772_v40  ;;  %v2238_v20 = vrot.slane %v2222_v30, %v3772_v40  ;;  %v2253_v48 = vcombine.high %v2231_v55, %v2231_v55 }
 0xd2b   : > { %v2260_v2 = vrot.slane %v2231_v55, %v3745_v15 }
 0xd2c   : > { %v2252_v18 = vrot.slane %v2224_v32, %v3772_v40  ;;  %v2255_v63 = vcombine.high %v2245_v49, %v2245_v49  ;;  %v2264_v53 = vrot.slane %v2245_v49, %v3745_v15  ;;  %v2254_v4 = vcombine.high %v2238_v20, %v2238_v20  ;;  %v2328_v40 = vpop.permute.xlu0 %2327 }
 0xd2d   : > { %v2268_v7 = vrot.slane %v2253_v48, %v3745_v15  ;;  %v2276_v10 = vrot.slane %v2238_v20, %v3745_v15 }
 0xd2e   : > { %2370 = vrot.lane.b32.xlu1 %v2368_v23, %s3512_s19  ;;  %v2256_v50 = vcombine.high %v2252_v18, %v2252_v18  ;;  %v2272_v54 = vrot.slane %v2255_v63, %v3745_v15  ;;  %v2280_v25 = vrot.slane %v2252_v18, %v3745_v15  ;;  %v2284_v19 = vrot.slane %v2254_v4, %v3745_v15  ;;  %s3125_s19 = sshll.u32 %s3578_s28, 7  ;;  %s3440_s28 = sshll.u32 %s3516_s30, 4  ;;  %s3441_s28 = int_to_ptr.vmem [resolvable:$false] %s3440_s28 }
 0xd2f   : > { %s2964_s20 = scalar_lea.hbm %s4304_s7, %s3125_s19  ;;  %s3442_s21 = scalar_lea.vmem %s3441_s28, 256 }
 0xd30   : > { %v2288_v21 = vrot.slane %v2256_v50, %v3745_v15  ;;  %v2332_v30 = vpop.permute.xlu0 %2331 }
 0xd98   : > { %v2299_v56 = vpop.permute.xlu1 %2298 }
 0xd99   : > { %v2302_v14 = vadd.f32 %v2299_v56, %v2264_v53  ;;  %v2301_v35 = vadd.f32 %v2299_v56, %v2260_v2  ;;  %v2304_v12 = vadd.f32 %v2299_v56, %v2272_v54  ;;  %v2303_v6 = vadd.f32 %v2299_v56, %v2268_v7 }
 0xd9a   : > { %v2306_v57 = vadd.f32 %v2299_v56, %v2280_v25  ;;  %v2305_v47 = vadd.f32 %v2299_v56, %v2276_v10  ;;  %v2308_v24 = vadd.f32 %v2299_v56, %v2288_v21  ;;  %v2307_v27 = vadd.f32 %v2299_v56, %v2284_v19 }
 0xd9b   : > { %v2342_v17 = vadd.f32 %v2320_v52, %v2302_v14  ;;  %v2341_v33 = vadd.f32 %v2318_v11, %v2301_v35  ;;  %v2344_v34 = vadd.f32 %v2324_v46, %v2304_v12  ;;  %v2343_v22 = vadd.f32 %v2322_v61, %v2303_v6 }
 0xd9c   : > { %v2330_v62 = vpop.permute.xlu1 %2329  ;;  %v2346_v37 = vadd.f32 %v2328_v40, %v2306_v57  ;;  %v2345_v39 = vadd.f32 %v2326_v1, %v2305_v47  ;;  %v2348_v63 = vadd.f32 %v2332_v30, %v2308_v24 }
 0xd9d   : > { %v2350_v23 = vmul.f32 0.2, %v2342_v17  ;;  %v2349_v45 = vmul.f32 0.2, %v2341_v33  ;;  %v2352_v26 = vmul.f32 0.2, %v2344_v34  ;;  %v2347_v49 = vadd.f32 %v2330_v62, %v2307_v27 }
 0xd9e   : > { %v2351_v28 = vmul.f32 0.2, %v2343_v22  ;;  %v2354_v18 = vmul.f32 0.2, %v2346_v37  ;;  %v2353_v20 = vmul.f32 0.2, %v2345_v39 }
 0xd9f   : > { %v2358_v31 = vmax.f32 %v2342_v17, %v2350_v23  ;;  %v2357_v32 = vmax.f32 %v2341_v33, %v2349_v45  ;;  %v2360_v52 = vmax.f32 %v2344_v34, %v2352_v26  ;;  %v2355_v48 = vmul.f32 0.2, %v2347_v49 }
 0xda0   : > { %v2371_v55 = vpop.permute.xlu1 %2370  ;;  %v2359_v61 = vmax.f32 %v2343_v22, %v2351_v28  ;;  %v2362_v1 = vmax.f32 %v2346_v37, %v2354_v18  ;;  %v2361_v53 = vmax.f32 %v2345_v39, %v2353_v20  ;;  %v2356_v54 = vmul.f32 0.2, %v2348_v63 }
 0xda1   : > { %v2374_v11 = vmul.f32 %v2371_v55, %v2358_v31  ;;  %v2373_v46 = vmul.f32 %v2371_v55, %v2357_v32  ;;  %v2376_v50 = vmul.f32 %v2371_v55, %v2360_v52  ;;  %v2363_v4 = vmax.f32 %v2347_v49, %v2355_v48 }
 0xda2   : > { %v2375_v2 = vmul.f32 %v2371_v55, %v2359_v61  ;;  %v2378_v7 = vmul.f32 %v2371_v55, %v2362_v1  ;;  %v2377_v10 = vmul.f32 %v2371_v55, %v2361_v53  ;;  %v2364_v25 = vmax.f32 %v2348_v63, %v2356_v54 }
 0xda3   : > { %2391 = vrot.lane.b32.xlu1 %v2374_v11, %s3514_s6  ;;  %2389 = vrot.lane.b32.xlu0 %v2373_v46, %s3514_s6  ;;  %v2379_v40 = vmul.f32 %v2371_v55, %v2363_v4 }
 0xda4   : > { %v2380_v56 = vmul.f32 %v2371_v55, %v2364_v25 }
 0xda7   : > { %2395 = vrot.lane.b32.xlu1 %v2376_v50, %s3514_s6  ;;  %2393 = vrot.lane.b32.xlu0 %v2375_v2, %s3514_s6 }
 0xdab   : > { %2399 = vrot.lane.b32.xlu1 %v2378_v7, %s3514_s6  ;;  %2397 = vrot.lane.b32.xlu0 %v2377_v10, %s3514_s6 }
 0xdaf   : > { %2403 = vrot.lane.b32.xlu1 %v2380_v56, %s3514_s6  ;;  %2401 = vrot.lane.b32.xlu0 %v2379_v40, %s3514_s6  ;;  %s336_s6 = scalar_lea.vmem [#allocation7], %s3079_s14 }
 0xdb0   : > { %s2966_s10 = sshll.u32 %s336_s6, 4  ;;  %s2967_s10 = int_to_ptr.vmem [resolvable:$true] %s2966_s10 }
 0xdb1   : > { %s3436_s9 = scalar_lea.vmem %s2967_s10, 128  ;;  %p3443_p2 = scmp.lt.s32.totalorder %s2967_s10, %s3441_s28 }
 0xdb2   : > { %p3437_p3 = scmp.ne.s32.totalorder %s2967_s10, %s3436_s9  ;;  %p3444_p13 = scmp.lt.s32.totalorder %s3442_s21, %s3436_s9 }
 0xdb4   : > { %p3438_p7 = pnand %p3437_p3, %p4323_p11  ;;  %p3445_p0 = por %p3444_p13, %p3443_p2 }
 0xdb6   : > { %p3439_p10 = pneg %p3438_p7 }
 0xdb8   : > { %p3446_p5 = pnand %p3445_p0, %p3439_p10 }
 0xe15   : > { %v2392_v14 = vpop.permute.xlu1 %2391  ;;  %v2390_v35 = vpop.permute.xlu0 %2389 }
 0xe16   : > { %v2416_v12 = vsel %vm374_vm3, %v2392_v14, 0.0  ;;  %v2413_v21 = vsel %vm374_vm3, %v2390_v35, 0.0 }
 0xe17   : > { %2417 = vadd.xlane.f32.xlu1 %v2416_v12  ;;  %2414 = vadd.xlane.f32.xlu0 %v2413_v21 }
 0xe19   : > { %v2396_v6 = vpop.permute.xlu1 %2395  ;;  %v2394_v57 = vpop.permute.xlu0 %2393 }
 0xe1a   : > { %v2419_v47 = vsel %vm374_vm3, %v2394_v57, 0.0  ;;  %v2422_v33 = vsel %vm374_vm3, %v2396_v6, 0.0 }
 0xe1b   : > { %2420 = vadd.xlane.f32.xlu0 %v2419_v47 }
 0xe1d   : > { %v2400_v19 = vpop.permute.xlu1 %2399  ;;  %v2398_v17 = vpop.permute.xlu0 %2397 }
 0xe1e   : > { %v2428_v34 = vsel %vm374_vm3, %v2400_v19, 0.0  ;;  %v2425_v22 = vsel %vm374_vm3, %v2398_v17, 0.0 }
 0xe1f   : > { %2429 = vadd.xlane.f32.xlu1 %v2428_v34  ;;  %2423 = vadd.xlane.f32.xlu0 %v2422_v33 }
 0xe21   : > { %v2404_v62 = vpop.permute.xlu1 %2403  ;;  %v2402_v39 = vpop.permute.xlu0 %2401 }
 0xe22   : > { %v2434_v37 = vsel %vm374_vm3, %v2404_v62, 0.0  ;;  %v2431_v24 = vsel %vm374_vm3, %v2402_v39, 0.0 }
 0xe23   : > { %2435 = vadd.xlane.f32.xlu1 %v2434_v37  ;;  %2426 = vadd.xlane.f32.xlu0 %v2425_v22 }
 0xe27   : > { %2432 = vadd.xlane.f32.xlu0 %v2431_v24 }
 0xea0   : > { %v2418_v23 = vpop.xlane.xlu1 %2417  ;;  %v2415_v45 = vpop.xlane.xlu0 %2414 }
 0xea1   : > { %v2438_v26 = vadd.f32 %v2418_v23, %v3813_v13  ;;  %v2437_v27 = vadd.f32 %v2415_v45, %v3815_v16 }
 0xea3   : > { %2457 = vperm.xlu1 %3312, %v2438_v26   ;;  %2454 = vperm.xlu0 %3313, %v2437_v27  }
 0xea4   : > { %v2421_v28 = vpop.xlane.xlu0 %2420 }
 0xea5   : > { %v2439_v30 = vadd.f32 %v2421_v28, %v3835_v41 }
 0xea7   : > { %2460 = vperm.xlu1 %3312, %v2439_v30  }
 0xea8   : > { %v2430_v31 = vpop.xlane.xlu1 %2429  ;;  %v2424_v32 = vpop.xlane.xlu0 %2423 }
 0xea9   : > { %v2440_v49 = vadd.f32 %v2424_v32, %v3837_v42  ;;  %v2442_v18 = vadd.f32 %v2430_v31, %v3841_v44 }
 0xeab   : > { %2463 = vperm.xlu1 %3312, %v2440_v49  }
 0xeac   : > { %v2427_v55 = vpop.xlane.xlu0 %2426  ;;  %v2436_v63 = vpop.xlane.xlu1 %2435 }
 0xead   : > { %v2441_v20 = vadd.f32 %v2427_v55, %v3839_v43  ;;  %v2444_v16 = vadd.f32 %v2436_v63, %v3860_v59 }
 0xeaf   : > { %2469 = vperm.xlu1 %3312, %v2442_v18   ;;  %2466 = vperm.xlu0 %3313, %v2441_v20  }
 0xeb0   : > { %v2433_v13 = vpop.xlane.xlu0 %2432 }
 0xeb1   : > { %v2443_v11 = vadd.f32 %v2433_v13, %v3858_v58 }
 0xeb3   : > { %2475 = vperm.xlu1 %3312, %v2444_v16   ;;  %2472 = vperm.xlu0 %3313, %v2443_v11  }
 0xf1e   : > { %v2458_v41 = vpop.permute.xlu1 %2457  ;;  %v2455_v52 = vpop.permute.xlu0 %2454 }
 0xf1f   : > { %v2484_v42 = vrot.slane %v2458_v41, %v3872_v9  ;;  %v2480_v61 = vrot.slane %v2455_v52, %v3872_v9 }
 0xf21   : > { %v2509_v1 = vsel %vm905_vm4, %v2484_v42, %v2480_v61 }
 0xf22   : > { %v2461_v46 = vpop.permute.xlu1 %2460 }
 0xf23   : > { %v2488_v43 = vrot.slane %v2461_v46, %v3872_v9 }
 0xf25   : > { %v2510_v58 = vsel %vm907_vm5, %v2488_v43, %v2509_v1 }
 0xf26   : > { %v2464_v44 = vpop.permute.xlu1 %2463 }
 0xf27   : > { %v2492_v48 = vrot.slane %v2464_v44, %v3872_v9 }
 0xf29   : > { %v2511_v53 = vsel %vm909_vm6, %v2492_v48, %v2510_v58 }
 0xf2a   : > { %v2470_v50 = vpop.permute.xlu1 %2469  ;;  %v2467_v59 = vpop.permute.xlu0 %2466 }
 0xf2b   : > { %v2496_v2 = vrot.slane %v2467_v59, %v3872_v9  ;;  %v2500_v54 = vrot.slane %v2470_v50, %v3872_v9 }
 0xf2d   : > { %v2512_v4 = vsel %vm911_vm7, %v2496_v2, %v2511_v53 }
 0xf2e   : > { %v2476_v7 = vpop.permute.xlu1 %2475  ;;  %v2473_v10 = vpop.permute.xlu0 %2472  ;;  %v2513_v40 = vsel %vm913_vm8, %v2500_v54, %v2512_v4 }
 0xf2f   : > { %v2508_v25 = vrot.slane %v2476_v7, %v3872_v9  ;;  %v2504_v56 = vrot.slane %v2473_v10, %v3872_v9 }
 0xf31   : > { %v2514_v14 = vsel %vm915_vm9, %v2504_v56, %v2513_v40 }
 0xf32   : > { %v2515_v35 = vsel %vm917_vm10, %v2508_v25, %v2514_v14 }
 0xf33   : > { %v2517_v12 = vsel %vm920_vm11, %v2515_v35, -inf }
 0xf34   : > { %2518 = vmax.xlane.f32.xlu0 %v2517_v12 }
 0xfbd   : > { %v2519_v21 = vpop.xlane.xlu0 %2518 }
 0xfbe   : > { %v2524_v6 = vrot.slane %v2519_v21, %v3745_v15  ;;  %v2528_v57 = vrot.slane %v2519_v21, %v3709_v8  ;;  %v2552_v47 = vrot.slane %v2519_v21, %v3831_v38  ;;  %v2532_v19 = vrot.slane %v2519_v21, %v3756_v29 }
 0xfbf   : > { %v2536_v22 = vrot.slane %v2519_v21, %v3795_v60  ;;  %v2540_v23 = vrot.slane %v2519_v21, %v3802_v3  ;;  %v2544_v31 = vrot.slane %v2519_v21, %v3807_v5 }
 0xfc0   : > { %v2561_v17 = vsub.f32 %v2437_v27, %v2524_v6  ;;  %v2562_v33 = vsub.f32 %v2438_v26, %v2528_v57  ;;  %v2568_v62 = vsub.f32 %v2444_v16, %v2552_v47  ;;  %v2563_v37 = vsub.f32 %v2439_v30, %v2532_v19 }
 0xfc1   : > { %v2564_v45 = vsub.f32 %v2440_v49, %v2536_v22  ;;  %v2565_v32 = vsub.f32 %v2441_v20, %v2540_v23  ;;  %v2548_v26 = vrot.slane %v2519_v21, %v3826_v36  ;;  %v2566_v55 = vsub.f32 %v2442_v18, %v2544_v31 }
 0xfc2   : > { %v2569_v34 = vmul.f32 1.442695, %v2561_v17  ;;  %v2571_v39 = vmul.f32 1.442695, %v2562_v33  ;;  %v2583_v24 = vmul.f32 1.442695, %v2568_v62 }
 0xfc3   : > { %v2573_v28 = vmul.f32 1.442695, %v2563_v37  ;;  %v2575_v27 = vmul.f32 1.442695, %v2564_v45  ;;  %v2577_v63 = vmul.f32 1.442695, %v2565_v32  ;;  %v2567_v13 = vsub.f32 %v2443_v11, %v2548_v26 }
 0xfc4   : > { %3360 = vpow2.f32 %v2569_v34  ;;  %v2579_v16 = vmul.f32 1.442695, %v2566_v55 }
 0xfc5   : > { %3362 = vpow2.f32 %v2571_v39  ;;  %v2581_v46 = vmul.f32 1.442695, %v2567_v13 }
 0xfc6   : > { %3364 = vpow2.f32 %v2583_v24 }
 0xfc7   : > { %3366 = vpow2.f32 %v2573_v28 }
 0xfc8   : > { %3368 = vpow2.f32 %v2575_v27 }
 0xfc9   : > { %3370 = vpow2.f32 %v2577_v63 }
 0xfca   : > { %3372 = vpow2.f32 %v2579_v16 }
 0xfcb   : > { %3374 = vpow2.f32 %v2581_v46 }
 0xfd1   : > { %v3361_v30 = vpop.eup %3360 }
 0xfd2   : > { %2594 = vperm.xlu1 %3312, %v3361_v30   ;;  %v3363_v41 = vpop.eup %3362 }
 0xfd3   : > { %v4209_v49 = vpop.eup %3364 }
 0xfd4   : > { %v3367_v52 = vpop.eup %3366  ;;  %2615 = vperm.xlu0 %3313, %v4209_v49  }
 0xfd5   : > { %v3369_v20 = vpop.eup %3368 }
 0xfd6   : > { %2597 = vperm.xlu1 %3312, %v3363_v41   ;;  %v3371_v18 = vpop.eup %3370 }
 0xfd7   : > { %v3373_v42 = vpop.eup %3372 }
 0xfd8   : > { %v3375_v11 = vpop.eup %3374 }
 0xfda   : > { %2600 = vperm.xlu1 %3312, %v3367_v52  }
 0xfde   : > { %2603 = vperm.xlu1 %3312, %v3369_v20  }
 0xfe2   : > { %2606 = vperm.xlu1 %3312, %v3371_v18  }
 0xfe6   : > { %2609 = vperm.xlu1 %3312, %v3373_v42  }
 0xfea   : > { %2612 = vperm.xlu1 %3312, %v3375_v11  }
0x104d   : > { %v2595_v61 = vpop.permute.xlu1 %2594 }
0x104e   : > { %v2620_v58 = vrot.slane %v2595_v61, %v3872_v9 }
0x104f   : > { %v2616_v10 = vpop.permute.xlu0 %2615 }
0x1050   : > { %v2648_v12 = vrot.slane %v2616_v10, %v3872_v9 }
0x1051   : > { %v2598_v44 = vpop.permute.xlu1 %2597 }
0x1052   : > { %v2624_v50 = vrot.slane %v2598_v44, %v3872_v9 }
0x1054   : > { %v2649_v4 = vsel %vm905_vm4, %v2624_v50, %v2620_v58  ;;  %v2871_v58 = vld [vmem:[#allocation5 + $0x10] sm:$0xff] }
0x1055   : > { %v2601_v43 = vpop.permute.xlu1 %2600 }
0x1056   : > { %v2628_v59 = vrot.slane %v2601_v43, %v3872_v9 }
0x1058   : > { %v2650_v25 = vsel %vm907_vm5, %v2628_v59, %v2649_v4  ;;  %v2872_v59 = vld [vmem:[#allocation5 + $0x18] sm:$0xff] }
0x1059   : > { %v2604_v48 = vpop.permute.xlu1 %2603  ;;  %3234 = vmatpush3.msra.mxu1 %v2872_v59 }
0x105a   : > { %v2632_v2 = vrot.slane %v2604_v48, %v3872_v9  ;;  %3235 = vmatprep.subr.mxu1 %v3510_v0 }
0x105b   : > { %3236 = vmatpush3.msra.mxu1 %v2871_v58 }
0x105c   : > { %v2651_v56 = vsel %vm909_vm6, %v2632_v2, %v2650_v25  ;;  %v2870_v2 = vld [vmem:[#allocation5 + $0x8] sm:$0xff]  ;;  %3237 = vmatprep.subr.mxu1 %v3510_v0 }
0x105d   : > { %v2607_v1 = vpop.permute.xlu1 %2606  ;;  %3238 = vmatpush3.msra.mxu1 %v2870_v2 }
0x105e   : > { %v2636_v54 = vrot.slane %v2607_v1, %v3872_v9  ;;  %3239 = vmatprep.subr.mxu1 %v3510_v0 }
0x1060   : > { %v2652_v14 = vsel %vm911_vm7, %v2636_v54, %v2651_v56 }
0x1061   : > { %v2610_v53 = vpop.permute.xlu1 %2609 }
0x1062   : > { %v2640_v7 = vrot.slane %v2610_v53, %v3872_v9  ;;  %v2869_v53 = vld [vmem:[#allocation5] sm:$0xff] }
0x1063   : > { %3240 = vmatpush3.msra.mxu1 %v2869_v53 }
0x1064   : > { %v2653_v21 = vsel %vm913_vm8, %v2640_v7, %v2652_v14 }
0x1065   : > { %v2613_v40 = vpop.permute.xlu1 %2612 }
0x1066   : > { %v2644_v35 = vrot.slane %v2613_v40, %v3872_v9 }
0x1068   : > { %v2654_v6 = vsel %vm915_vm9, %v2644_v35, %v2653_v21 }
0x1069   : > { %v2655_v57 = vsel %vm917_vm10, %v2648_v12, %v2654_v6 }
0x106a   : > { %v2657_v47 = vsel %vm920_vm11, %v2655_v57, 0.0 }
0x106b   : > { %2658 = vadd.xlane.f32.xlu1 %v2657_v47 }
0x10f4   : > { %v2659_v19 = vpop.xlane.xlu1 %2658 }
0x10f5   : > { %3376 = vrcp.f32 %v2659_v19 }
0x1102   : > { %v3377_v17 = vpop.eup %3376 }
0x1103   : > { %v2681_v33 = vrot.slane %v3377_v17, %v3802_v3  ;;  %v2665_v34 = vrot.slane %v3377_v17, %v3745_v15  ;;  %v2669_v37 = vrot.slane %v3377_v17, %v3709_v8  ;;  %v2673_v24 = vrot.slane %v3377_v17, %v3756_v29 }
0x1104   : > { %v2677_v45 = vrot.slane %v3377_v17, %v3795_v60  ;;  %v2685_v31 = vrot.slane %v3377_v17, %v3807_v5  ;;  %v2689_v32 = vrot.slane %v3377_v17, %v3826_v36  ;;  %v2693_v8 = vrot.slane %v3377_v17, %v3831_v38 }
0x1105   : > { %v2706_v62 = vmul.f32 %v3371_v18, %v2681_v33  ;;  %v2702_v22 = vmul.f32 %v3361_v30, %v2665_v34  ;;  %v2703_v39 = vmul.f32 %v3363_v41, %v2669_v37  ;;  %v2704_v23 = vmul.f32 %v3367_v52, %v2673_v24 }
0x1106   : > { %v2705_v28 = vmul.f32 %v3369_v20, %v2677_v45  ;;  %v2707_v3 = vmul.f32 %v3373_v42, %v2685_v31  ;;  %v2708_v27 = vmul.f32 %v3375_v11, %v2689_v32  ;;  %v2709_v26 = vmul.f32 %v4209_v49, %v2693_v8 }
0x1107   : > { %2735 = vperm.xlu1 %3312, %v2706_v62   ;;  %2723 = vperm.xlu0 %3313, %v2702_v22  }
0x110b   : > { %2726 = vperm.xlu0 %3313, %v2703_v39  }
0x110f   : > { %2729 = vperm.xlu0 %3313, %v2704_v23  }
0x1113   : > { %2732 = vperm.xlu0 %3313, %v2705_v28  }
0x1117   : > { %2738 = vperm.xlu0 %3313, %v2707_v3  }
0x111b   : > { %2741 = vperm.xlu0 %3313, %v2708_v27  }
0x111f   : > { %2744 = vperm.xlu0 %3313, %v2709_v26  }
0x1182   : > { %v2724_v29 = vpop.permute.xlu0 %2723  ;;  %v2736_v46 = vpop.permute.xlu1 %2735 }
0x1183   : > { %v2749_v41 = vrot.slane %v2724_v29, %v3872_v9  ;;  %v2765_v42 = vrot.slane %v2736_v46, %v3872_v9 }
0x1186   : > { %v2727_v55 = vpop.permute.xlu0 %2726 }
0x1187   : > { %v2753_v13 = vrot.slane %v2727_v55, %v3872_v9 }
0x1189   : > { %v2778_v38 = vsel %vm905_vm4, %v2753_v13, %v2749_v41 }
0x118a   : > { %v2730_v63 = vpop.permute.xlu0 %2729 }
0x118b   : > { %v2757_v5 = vrot.slane %v2730_v63, %v3872_v9 }
0x118d   : > { %v2779_v52 = vsel %vm907_vm5, %v2757_v5, %v2778_v38 }
0x118e   : > { %v2733_v30 = vpop.permute.xlu0 %2732 }
0x118f   : > { %v2761_v36 = vrot.slane %v2733_v30, %v3872_v9 }
0x1191   : > { %v2780_v20 = vsel %vm909_vm6, %v2761_v36, %v2779_v52 }
0x1192   : > { %v2739_v16 = vpop.permute.xlu0 %2738  ;;  %v2781_v61 = vsel %vm911_vm7, %v2765_v42, %v2780_v20 }
0x1193   : > { %v2769_v18 = vrot.slane %v2739_v16, %v3872_v9 }
0x1195   : > { %v2782_v43 = vsel %vm913_vm8, %v2769_v18, %v2781_v61 }
0x1196   : > { %v2742_v49 = vpop.permute.xlu0 %2741 }
0x1197   : > { %v2773_v11 = vrot.slane %v2742_v49, %v3872_v9 }
0x1199   : > { %v2783_v1 = vsel %vm915_vm9, %v2773_v11, %v2782_v43 }
0x119a   : > { %v2745_v44 = vpop.permute.xlu0 %2744 }
0x119b   : > { %v2777_v48 = vrot.slane %v2745_v44, %v3872_v9  ;;  %v2713_v9 = vrot.slane %v4123_v51, %v3795_v60  ;;  %v2873_v60 = vld [vmem:[#allocation5 + $0x20] sm:$0x1] }
0x119d   : > { %v2784_v50 = vsel %vm917_vm10, %v2777_v48, %v2783_v1 }
0x119e   : > { %3231 = vmatmul.mubr.msk.f32.vlgmr.msra.gmra.mxu0 %vm920_vm11, %v2784_v50 }
0x125e   : > { %v2853_v54 = vpop.f32.mrf.mxu0 }
0x125f   : > { %v2854_v4 = vadd.f32 %v2853_v54, %v2713_v9 }
0x1260   : > { %v3232_v7 = vpop.f32.mrf.mxu0 }
0x1261   : > { %v2857_v10 = vmax.f32 %v2854_v4, 0.0 }
0x1263   : > { %v2858_v25 = vpack.c.bf16 %v2857_v10, %v2857_v10 }
0x1265   : > { %v2859_v56 = vunpack.c.l.bf16 %v2858_v25 }
0x1267   : > { %v2860_v40 = vsel %vm374_vm3, %v2859_v56, 0.0 }
0x1268   : > { %v2861_v14 = vrot.slane %v2860_v40, 4 }
0x126a   : > { %v2862_v35 = vadd.f32 %v2861_v14, %v2860_v40 }
0x126c   : > { %v2863_v12 = vrot.slane %v2862_v35, 2 }
0x126e   : > { %v2864_v21 = vadd.f32 %v2863_v12, %v2862_v35 }
0x1270   : > { %v2865_v6 = vrot.slane %v2864_v21, 1 }
0x1272   : > { %v2866_v0 = vadd.f32 %v2865_v6, %v2864_v21 }
0x1274   : > { %v2868_v57 = vmul.f32 0.125, %v2866_v0 }
0x1276   : > { %3242 = vmatmul.mubr.msk.f32.vlgmr.msra.gmra.mxu1 %vm374_vm3, %v2868_v57 }
0x1336   : > { %v2943_v51 = vpop.f32.mrf.mxu1 }
0x1337   : > { %v2944_v47 = vadd.f32 %v2943_v51, %v2873_v60 }
0x1338   : > { %v3243_v19 = vpop.f32.mrf.mxu1 }
0x1339   : > { %v2950_v17 = vrot.slane %v2944_v47, %v3745_v15 }
0x133b   : > { %2951 = vst [vmem:[%s336_s6] sm:$0xff] %v2950_v17 }
0x133c   : > { %3449 = shalt.err (!%p3446_p5)
}
0x133d   : > { %s3450_s15 = scalar_lea.hbm %s2964_s20, 128  ;;  %s3454_s12 = scalar_lea.hbm %s4304_s7, 256 }
0x133e   : > { %p3451_p9 = scmp.ne.s32.totalorder %s2964_s20, %s3450_s15  ;;  %p3455_p4 = scmp.lt.s32.totalorder %s2964_s20, %s4304_s7 }
0x133f   : > { %p3456_p6 = scmp.lt.s32.totalorder %s3454_s12, %s3450_s15 }
0x1340   : > { %p3452_p12 = pnand %p3451_p9, %p4323_p11 }
0x1341   : > { %p3457_p8 = por %p3456_p6, %p3455_p4 }
0x1342   : > { %p3453_p1 = pneg %p3452_p12 }
0x1344   : > { %p3458_p3 = pnand %p3457_p8, %p3453_p1 }
0x1346   : > { %3461 = shalt.err (!%p3458_p3)
}
0x1347   : > { %3253 = dma.vmem_to_hbm [thread:$0]  (%p4323_p11), %s2967_s10, 128, %s2964_s20, %s2953_s29  }
0x1348 PF: > { %s2978_s19 = sand.u32 1, %s3492_s24   ;;  %p4324_p7 = scmp.ne.s32.totalorder %s4311_s8, 0 }
0x1349   : > { %p4325_p10 = scmp.ge.s32.totalorder %s3504_s27, 2  ;;  %s2979_s6 = scalar_lea.sflag [#allocation4], %s2978_s19 }
0x134b   : > { %p3264_p2 = pnand %p4325_p10, %p4324_p7 }
0x134d   : > { %p3265_p13 = pneg %p3264_p2 }
0x134f   : > { %3487 = dma.done.wait (%p3265_p13), %s2979_s6, 128  }
0x1350   : > { %3489 = vsyncadd (%p3265_p13), %s2979_s6, 4294967168  ;;  %s4326_s11 = sld [smem:[#allocation11_spill]]  ;;  %p21_p0 = scmp.ge.s32.totalorder %s3611_s13, 4  }
0x1351   : > { %s4327_s24 = smov %s3496_s25  ;;  %s4328_s25 = smov %s3500_s26 }
0x1352   : > { %s4330_s27 = smov %s3611_s13  ;;  %23 = sbr.rel (!%p21_p0) target bundleno = 8 (0x8), region = 109 }
0x1356   : > { %s4329_s26 = smov %s4326_s11 }
0x1357   :  { %2984 = vsyncpa [#allocation3], 1 }
0x1358   :  { %2986 = vsyncpa [#allocation3 + $0x1], 1 }
0x1359   :  { %2987 = vsyncpa [#allocation6], 1 }
0x135a   :  { %2988 = vsyncpa [#allocation4], 1 }
0x135b   :  { %2990 = vsyncpa [#allocation4 + $0x1], 1 }

</bundles_post_ra>
